<compile_context>
chip_gen: v6e
topology: v6e:2x2x1
jax: 0.10.0
libtpu: 0.0.40
codegen_flags: <defaults>
</compile_context>

<pallas_src>
import jax
import jax.numpy as jnp
from jax.experimental import pallas as pl
from jax.experimental.pallas import tpu as pltpu


def _leaky_relu(x, slope=0.01):
    return jnp.where(x > 0, x, slope * x)


def _ceil(x, m):
    return ((x + m - 1) // m) * m


# ----------------------------------------------------------------------------
# Fused kernel factory (all sizes/offsets are Python statics baked at trace time)
# ----------------------------------------------------------------------------
def _make_hoist_kernel(cfg):
    N, T, R = cfg["N"], cfg["T"], cfg["R"]
    dyn_dims = cfg["dynamic_dims"]
    n_dyn = len(dyn_dims)
    F_tot = sum(dyn_dims)
    H = n_dyn * R                       # packed MLP hidden width (block-diag)
    n_stat = cfg["n_stat"]
    Ds_tot = cfg["Ds_tot"]
    Dd = cfg["Dd"]
    has_dist = Dd > 0
    has_spatial = (n_stat > 0) or has_dist
    off = cfg["offsets"]
    has_sign = cfg["has_sign"]

    def kernel(*refs):
        it = iter(refs)
        p_ref = next(it)                                   # (P_rows, PW) param slab
        x_ref = next(it)                                   # (T*N, F_tot) dyn feats (time-major)
        s_ref = next(it) if n_stat > 0 else None           # (N, Ds_tot)
        d_ref = next(it) if has_dist else None             # (Dd, N, N)
        y_ref = next(it)                                   # (T*N, 1)
        w_ref = next(it)                                   # (T*N, F_tot) dynamic weights
        hn_ref = next(it)                                  # (N, R)
        cn_ref = next(it)                                  # (N, R)
        sdis_ref = next(it) if has_spatial else None       # (N, N)
        h_all = next(it)                                   # scratch (T*N, R)

        f32 = jnp.float32

        # ---- spatial relationship graph (static attention + distance) --------
        scale = None
        if has_spatial:
            score = jnp.zeros((N, N), dtype=f32)
            if n_stat > 0:
                # wa columns: [W_0@a1_0 | W_0@a2_0 | W_1@a1_1 | ...] (block rows)
                wa = p_ref[off["wa"]:off["wa"] + Ds_tot, :]
                uv = jnp.dot(s_ref[...], wa, preferred_element_type=f32)   # (N, PW)
                for i in range(n_stat):
                    u = uv[:, 2 * i:2 * i + 1]                              # s_i @ (W_i a1_i)
                    v = uv[:, 2 * i + 1:2 * i + 2]                          # s_i @ (W_i a2_i)
                    score = score + jax.nn.sigmoid(u + jnp.transpose(v))    # sigmoid per category
            if has_dist:
                coefs = p_ref[off["coef"]:off["coef"] + Dd, :]              # W_dis @ a_dis in col 0
                acc = jnp.zeros((N, N), dtype=f32)
                for d in range(Dd):
                    acc = acc + d_ref[d] * coefs[d:d + 1, 0:1]
                score = score + jax.nn.sigmoid(acc)                          # sum channels, then sigmoid
            m = jnp.max(score, axis=-1, keepdims=True)
            e = jnp.exp(score - m)
            sdis = e / jnp.sum(e, axis=-1, keepdims=True)
            sdis_ref[...] = sdis
            # reference mix: h + sum_j sdis[i,j] * h[i]  (broadcast of own h)
            scale = 1.0 + jnp.sum(sdis, axis=-1, keepdims=True)              # (N, 1) ~= 2.0

        # ---- dynamic-feature weights: block-diagonal MLP over all categories --
        x = x_ref[...]                                                       # (T*N, F_tot)
        w1 = p_ref[off["w1"]:off["w1"] + F_tot, :]                           # blockdiag(W1_i)
        b1 = p_ref[off["b1"]:off["b1"] + 1, :]
        hh = _leaky_relu(jnp.dot(x, w1, preferred_element_type=f32) + b1)    # (T*N, PW)
        w2 = p_ref[off["w2"]:off["w2"] + H, :]                               # blockdiag(W2_i)
        b2 = p_ref[off["b2"]:off["b2"] + 1, :]
        z = jnp.dot(hh[:, :H], w2, preferred_element_type=f32) + b2          # (T*N, PW)
        wgt = jax.nn.sigmoid(z[:, :F_tot])                                   # (T*N, F_tot)
        if has_sign:
            sgn = p_ref[off["sign"]:off["sign"] + 1, :]
            wgt = wgt * sgn[:, :F_tot]
        w_ref[...] = wgt

        # ---- LSTM input projection for all time steps at once ----------------
        w_ih = p_ref[off["w_ih"]:off["w_ih"] + F_tot, :]                     # (F_tot, 4R) [i|f|o|g]
        b_l = p_ref[off["b_lstm"]:off["b_lstm"] + 1, :]                      # b_ih + b_hh folded
        gates_x = jnp.dot(wgt * x, w_ih, preferred_element_type=f32) + b_l   # (T*N, 4R)

        # ---- LSTM recurrence (gate columns pre-permuted to [i|f|o|g]) --------
        w_hh = p_ref[off["w_hh"]:off["w_hh"] + R, :]                          # (R, 4R)
        h = jnp.zeros((N, R), dtype=f32)
        c = jnp.zeros((N, R), dtype=f32)
        for t in range(T):
            g = gates_x[t * N:(t + 1) * N, :] + jnp.dot(
                h, w_hh, preferred_element_type=f32)                          # (N, 4R)
            sg = jax.nn.sigmoid(g[:, :3 * R])                                 # i | f | o
            gg = jnp.tanh(g[:, 3 * R:4 * R])                                  # g
            c = sg[:, R:2 * R] * c + sg[:, :R] * gg
            h = sg[:, 2 * R:3 * R] * jnp.tanh(c)
            # spatial mix is applied AFTER the LSTM in the reference, so the
            # recurrence uses the un-mixed h; only the head sees the scaled one.
            h_all[t * N:(t + 1) * N, :] = h if scale is None else h * scale
        hn_ref[...] = h
        cn_ref[...] = c

        # ---- output head on the whole (T*N, R) slab ---------------------------
        hs = h_all[...]
        w_lin = p_ref[off["w_lin"]:off["w_lin"] + R, :]
        b_lin = p_ref[off["b_lin"]:off["b_lin"] + 1, :]
        g1 = _leaky_relu(jnp.dot(hs, w_lin, preferred_element_type=f32) + b_lin)
        w_lin2 = p_ref[off["w_lin2"]:off["w_lin2"] + R, :]
        b_lin2 = p_ref[off["b_lin2"]:off["b_lin2"] + 1, :]
        y = jnp.dot(g1[:, :R], w_lin2, preferred_element_type=f32) + b_lin2   # col 0 is y
        y_ref[...] = y[:, 0:1]

    return kernel


# ----------------------------------------------------------------------------
# Host-side parameter packing: one f32 slab, 8-row-aligned segments, 128-lane width
# ----------------------------------------------------------------------------
def pack_hoist_params(params, dynamic_dims, static_dims=None, distance_dims=None, signs=None):
    f32 = jnp.float32
    R = int(params["rnn_dim"])
    dyn_dims = [int(d) for d in dynamic_dims]
    n_dyn = len(dyn_dims)
    F_tot = sum(dyn_dims)
    H = n_dyn * R
    stat_dims = [int(d) for d in static_dims] if static_dims is not None else []
    n_stat = len(stat_dims)
    Ds_tot = sum(stat_dims)
    Dd = int(distance_dims) if distance_dims is not None else 0

    widths = [H, F_tot, 4 * R, R, 1]
    if n_stat:
        widths.append(2 * n_stat)
    PW = _ceil(max(widths), 128)

    # --- block-diagonal per-category MLP weights / concatenated biases ---
    W1 = jnp.zeros((F_tot, H), f32)
    W2 = jnp.zeros((H, F_tot), f32)
    b1s, b2s = [], []
    o = 0
    for i, D in enumerate(dyn_dims):
        w1, b1, w2, b2 = params["dyn_mlp"][i]
        W1 = W1.at[o:o + D, i * R:(i + 1) * R].set(w1)
        W2 = W2.at[i * R:(i + 1) * R, o:o + D].set(w2)
        b1s.append(b1)
        b2s.append(b2)
        o += D
    b1_cat = jnp.concatenate(b1s, axis=1)                 # (1, H)
    b2_cat = jnp.concatenate(b2s, axis=1)                 # (1, F_tot)

    # --- LSTM: permute gate columns [i|f|g|o] (PyTorch order) -> [i|f|o|g] ---
    def _perm_gates(w):
        return jnp.concatenate([w[:, 0:2 * R], w[:, 3 * R:4 * R], w[:, 2 * R:3 * R]], axis=1)

    W_ih = _perm_gates(params["W_ih"])
    W_hh = _perm_gates(params["W_hh"])
    b_lstm = _perm_gates(params["b_lstm"])

    segs, offsets = [], {}

    def add(name, mat):
        mat = jnp.asarray(mat, f32)
        r, c = mat.shape
        rp = _ceil(r, 8)
        offsets[name] = sum(s.shape[0] for s in segs)
        segs.append(jnp.pad(mat, ((0, rp - r), (0, PW - c))))

    add("w1", W1); add("b1", b1_cat); add("w2", W2); add("b2", b2_cat)
    add("w_ih", W_ih); add("w_hh", W_hh); add("b_lstm", b_lstm)
    add("w_lin", params["W_lin"]); add("b_lin", params["b_lin"])
    add("w_lin2", params["W_lin2"]); add("b_lin2", params["b_lin2"])

    has_sign = signs is not None and any(int(s) != 1 for s in signs)
    if has_sign:
        cols = []
        for s, D in zip(signs, dyn_dims):
            cols += [float(s)] * D
        add("sign", jnp.asarray(cols, f32).reshape(1, F_tot))

    if n_stat:
        # hoist parameter-only algebra: WA[:, 2i] = W_i @ a1_i, WA[:, 2i+1] = W_i @ a2_i
        WA = jnp.zeros((Ds_tot, 2 * n_stat), f32)
        so = 0
        for i, D in enumerate(stat_dims):
            w_i = params["w_list"][i]
            a1, a2 = params["a_list"][i]
            WA = WA.at[so:so + D, 2 * i:2 * i + 1].set(jnp.dot(w_i, a1))
            WA = WA.at[so:so + D, 2 * i + 1:2 * i + 2].set(jnp.dot(w_i, a2))
            so += D
        add("wa", WA)
    if Dd:
        add("coef", jnp.dot(params["W_dis"], params["a_dis"]))   # (Dd, 1)

    P = jnp.concatenate(segs, axis=0)

    cfg = dict(R=R, dynamic_dims=tuple(dyn_dims), n_stat=n_stat, Ds_tot=Ds_tot,
               Dd=Dd, PW=PW, offsets=offsets, has_sign=has_sign)
    return {"P": P, "cfg": cfg}


# ----------------------------------------------------------------------------
# Forward wrapper (single grid-less pallas_call)
# ----------------------------------------------------------------------------
def hoist_forward(packed, dynamic, static=None, distance=None):
    cfg = dict(packed["cfg"])
    N, T = int(dynamic[0].shape[0]), int(dynamic[0].shape[1])
    R = cfg["R"]
    F_tot = sum(cfg["dynamic_dims"])
    n_stat, Dd = cfg["n_stat"], cfg["Dd"]
    has_spatial = (n_stat > 0) or (Dd > 0)
    cfg["N"], cfg["T"] = N, T

    kernel = _make_hoist_kernel(cfg)

    # one time-major slab of all dynamic features
    x_cat = jnp.concatenate(list(dynamic), axis=-1)                    # (N, T, F_tot)
    x_cat = jnp.transpose(x_cat, (1, 0, 2)).reshape(T * N, F_tot)      # (T*N, F_tot)

    inputs = [packed["P"], x_cat]
    if n_stat > 0:
        inputs.append(jnp.concatenate(list(static), axis=-1))          # (N, Ds_tot)
    if Dd > 0:
        inputs.append(jnp.transpose(distance, (2, 0, 1)))              # (Dd, N, N)

    out_shape = [jax.ShapeDtypeStruct((T * N, 1), jnp.float32),
                 jax.ShapeDtypeStruct((T * N, F_tot), jnp.float32),
                 jax.ShapeDtypeStruct((N, R), jnp.float32),
                 jax.ShapeDtypeStruct((N, R), jnp.float32)]
    if has_spatial:
        out_shape.append(jax.ShapeDtypeStruct((N, N), jnp.float32))

    outs = pl.pallas_call(
        kernel,
        out_shape=tuple(out_shape),
        scratch_shapes=[pltpu.VMEM((T * N, R), jnp.float32)],
    )(*inputs)

    y_tm, w_tm, hn, cn = outs[0], outs[1], outs[2], outs[3]
    static_dis = outs[4] if has_spatial else None

    y = jnp.transpose(y_tm.reshape(T, N, 1), (1, 0, 2))                # (N, T, 1)
    dynamic_weights = jnp.transpose(w_tm.reshape(T, N, F_tot), (1, 0, 2))  # (N, T, F_tot)
    hn = hn.reshape(1, N, R)
    cn = cn.reshape(1, N, R)
    # TODO(synk): the reference draws an unused random h0 when h0 is None (dead code) — omitted.
    return y, [static_dis, dynamic_weights, (hn, cn)]


# ----------------------------------------------------------------------------
# Deterministic synthetic parameters (shapes follow HOIST.__init__; LSTM weights
# stored as (in, 4R) with PyTorch gate order [i|f|g|o]; b_lstm = b_ih + b_hh folded)
# ----------------------------------------------------------------------------
def init_params(key, dynamic_dims, static_dims, distance_dims, rnn_dim):
    def nrm(k, shape, scale=0.1):
        return scale * jax.random.normal(k, shape, dtype=jnp.float32)

    keys = iter(jax.random.split(key, 64))
    params = {"rnn_dim": rnn_dim}

    params["dyn_mlp"] = []
    for D in dynamic_dims:
        params["dyn_mlp"].append((
            nrm(next(keys), (D, rnn_dim)), nrm(next(keys), (1, rnn_dim)),
            nrm(next(keys), (rnn_dim, D)), nrm(next(keys), (1, D)),
        ))

    F_tot = int(sum(dynamic_dims))
    params["W_ih"] = nrm(next(keys), (F_tot, 4 * rnn_dim))
    params["W_hh"] = nrm(next(keys), (rnn_dim, 4 * rnn_dim))
    params["b_lstm"] = nrm(next(keys), (1, 4 * rnn_dim))

    params["W_lin"] = nrm(next(keys), (rnn_dim, rnn_dim))
    params["b_lin"] = nrm(next(keys), (1, rnn_dim))
    params["W_lin2"] = nrm(next(keys), (rnn_dim, 1))
    params["b_lin2"] = nrm(next(keys), (1, 1))

    if static_dims is not None:
        params["w_list"] = [nrm(next(keys), (D, D)) for D in static_dims]
        # a_list[i] is (2*D, 1) in PyTorch; stored pre-split as (a1, a2), each (D, 1).
        params["a_list"] = [(nrm(next(keys), (D, 1)), nrm(next(keys), (D, 1)))
                            for D in static_dims]

    if distance_dims is not None:
        params["W_dis"] = nrm(next(keys), (distance_dims, distance_dims))
        params["a_dis"] = nrm(next(keys), (distance_dims, 1))

    return params


# ----------------------------------------------------------------------------
# Main
# ----------------------------------------------------------------------------
if __name__ == "__main__":
    N, T = 8, 8
    dynamic_dims = [4, 6]
    static_dims = [4, 3]
    distance_dims = 3
    rnn_dim = 32
    signs = [1, -1]

    key = jax.random.PRNGKey(0)
    k_params, k_dyn, k_stat, k_dist = jax.random.split(key, 4)

    params = init_params(k_params, dynamic_dims, static_dims, distance_dims, rnn_dim)
    packed = pack_hoist_params(params, dynamic_dims, static_dims, distance_dims, signs)

    dyn_keys = jax.random.split(k_dyn, len(dynamic_dims))
    dynamic = [jax.random.normal(dyn_keys[i], (N, T, D), dtype=jnp.float32)
               for i, D in enumerate(dynamic_dims)]
    stat_keys = jax.random.split(k_stat, len(static_dims))
    static = [jax.random.normal(stat_keys[i], (N, D), dtype=jnp.float32)
              for i, D in enumerate(static_dims)]
    distance = jax.random.normal(k_dist, (N, N, distance_dims), dtype=jnp.float32)

    y, (static_dis, dynamic_weights, (hn, cn)) = hoist_forward(
        packed, dynamic, static=static, distance=distance)

    jax.block_until_ready((y, static_dis, dynamic_weights, hn, cn))

    assert y.shape == (N, T, 1)
    assert static_dis.shape == (N, N)
    assert dynamic_weights.shape == (N, T, sum(dynamic_dims))
    assert hn.shape == (1, N, rnn_dim) and cn.shape == (1, N, rnn_dim)

    print("KERNEL_OK")
</pallas_src>

<mosaic_0001>
module attributes {stable_mosaic.version = 11 : i64} {
  func.func @kernel(%arg0: memref<256x128xf32, #tpu.memory_space<vmem>>, %arg1: memref<64x10xf32, #tpu.memory_space<vmem>>, %arg2: memref<8x7xf32, #tpu.memory_space<vmem>>, %arg3: memref<3x8x8xf32, #tpu.memory_space<vmem>>, %arg4: memref<64x1xf32, #tpu.memory_space<vmem>>, %arg5: memref<64x10xf32, #tpu.memory_space<vmem>>, %arg6: memref<8x32xf32, #tpu.memory_space<vmem>>, %arg7: memref<8x32xf32, #tpu.memory_space<vmem>>, %arg8: memref<8x8xf32, #tpu.memory_space<vmem>>, %arg9: memref<64x32xf32, #tpu.memory_space<vmem>>) attributes {dimension_semantics = [], scalar_prefetch = 0 : i64, scratch_operands = 1 : i64, tpu.core_type = #tpu.core_type<tc>} {
    %cst = arith.constant 0.000000e+00 : f32
    %0 = vector.broadcast %cst : f32 to vector<8x8xf32>
    %c240 = arith.constant 240 : index
    %c0 = arith.constant 0 : index
    %1 = vector.load %arg0[%c240, %c0] : memref<256x128xf32, #tpu.memory_space<vmem>>, vector<7x128xf32>
    %c0_0 = arith.constant 0 : index
    %c0_1 = arith.constant 0 : index
    %2 = vector.load %arg2[%c0_0, %c0_1] : memref<8x7xf32, #tpu.memory_space<vmem>>, vector<8x7xf32>
    %cst_2 = arith.constant dense<0.000000e+00> : vector<8x128xf32>
    %3 = tpu.matmul %2, %1, %cst_2 {dimension_numbers = #tpu.dot_dimension_numbers<[1], [0], [0], [1], [0, 0, 1, 1], [], []>} : vector<8x7xf32>, vector<7x128xf32>, vector<8x128xf32> -> vector<8x128xf32>
    %4 = vector.extract_strided_slice %3 {offsets = [0, 0], sizes = [8, 1], strides = [1, 1]} : vector<8x128xf32> to vector<8x1xf32>
    %5 = vector.extract_strided_slice %3 {offsets = [0, 1], sizes = [8, 1], strides = [1, 1]} : vector<8x128xf32> to vector<8x1xf32>
    %6 = tpu.transpose %5, [1, 0] : vector<8x1xf32> -> vector<1x8xf32>
    %7 = vector.broadcast %4 : vector<8x1xf32> to vector<8x8xf32>
    %8 = vector.broadcast %6 : vector<1x8xf32> to vector<8x8xf32>
    %9 = arith.addf %7, %8 : vector<8x8xf32>
    %10 = arith.negf %9 : vector<8x8xf32>
    %11 = math.exp %10 : vector<8x8xf32>
    %cst_3 = arith.constant 1.000000e+00 : f32
    %12 = vector.broadcast %cst_3 : f32 to vector<8x8xf32>
    %13 = arith.addf %12, %11 : vector<8x8xf32>
    %14 = arith.divf %12, %13 : vector<8x8xf32>
    %15 = arith.addf %0, %14 : vector<8x8xf32>
    %16 = vector.extract_strided_slice %3 {offsets = [0, 2], sizes = [8, 1], strides = [1, 1]} : vector<8x128xf32> to vector<8x1xf32>
    %17 = vector.extract_strided_slice %3 {offsets = [0, 3], sizes = [8, 1], strides = [1, 1]} : vector<8x128xf32> to vector<8x1xf32>
    %18 = tpu.transpose %17, [1, 0] : vector<8x1xf32> -> vector<1x8xf32>
    %19 = vector.broadcast %16 : vector<8x1xf32> to vector<8x8xf32>
    %20 = vector.broadcast %18 : vector<1x8xf32> to vector<8x8xf32>
    %21 = arith.addf %19, %20 : vector<8x8xf32>
    %22 = arith.negf %21 : vector<8x8xf32>
    %23 = math.exp %22 : vector<8x8xf32>
    %cst_4 = arith.constant 1.000000e+00 : f32
    %24 = vector.broadcast %cst_4 : f32 to vector<8x8xf32>
    %25 = arith.addf %24, %23 : vector<8x8xf32>
    %26 = arith.divf %24, %25 : vector<8x8xf32>
    %27 = arith.addf %15, %26 : vector<8x8xf32>
    %c248 = arith.constant 248 : index
    %c0_5 = arith.constant 0 : index
    %28 = vector.load %arg0[%c248, %c0_5] : memref<256x128xf32, #tpu.memory_space<vmem>>, vector<3x128xf32>
    %cst_6 = arith.constant 0.000000e+00 : f32
    %29 = vector.broadcast %cst_6 : f32 to vector<8x8xf32>
    %c0_7 = arith.constant 0 : index
    %c0_8 = arith.constant 0 : index
    %c0_9 = arith.constant 0 : index
    %30 = vector.load %arg3[%c0_7, %c0_8, %c0_9] : memref<3x8x8xf32, #tpu.memory_space<vmem>>, vector<1x8x8xf32>
    %31 = vector.shape_cast %30 : vector<1x8x8xf32> to vector<8x8xf32>
    %32 = vector.extract_strided_slice %28 {offsets = [0, 0], sizes = [1, 1], strides = [1, 1]} : vector<3x128xf32> to vector<1x1xf32>
    %33 = vector.broadcast %32 : vector<1x1xf32> to vector<8x8xf32>
    %34 = arith.mulf %31, %33 : vector<8x8xf32>
    %35 = arith.addf %29, %34 : vector<8x8xf32>
    %c1 = arith.constant 1 : index
    %c0_10 = arith.constant 0 : index
    %c0_11 = arith.constant 0 : index
    %36 = vector.load %arg3[%c1, %c0_10, %c0_11] : memref<3x8x8xf32, #tpu.memory_space<vmem>>, vector<1x8x8xf32>
    %37 = vector.shape_cast %36 : vector<1x8x8xf32> to vector<8x8xf32>
    %38 = vector.extract_strided_slice %28 {offsets = [1, 0], sizes = [1, 1], strides = [1, 1]} : vector<3x128xf32> to vector<1x1xf32>
    %39 = vector.broadcast %38 : vector<1x1xf32> to vector<8x8xf32>
    %40 = arith.mulf %37, %39 : vector<8x8xf32>
    %41 = arith.addf %35, %40 : vector<8x8xf32>
    %c2 = arith.constant 2 : index
    %c0_12 = arith.constant 0 : index
    %c0_13 = arith.constant 0 : index
    %42 = vector.load %arg3[%c2, %c0_12, %c0_13] : memref<3x8x8xf32, #tpu.memory_space<vmem>>, vector<1x8x8xf32>
    %43 = vector.shape_cast %42 : vector<1x8x8xf32> to vector<8x8xf32>
    %44 = vector.extract_strided_slice %28 {offsets = [2, 0], sizes = [1, 1], strides = [1, 1]} : vector<3x128xf32> to vector<1x1xf32>
    %45 = vector.broadcast %44 : vector<1x1xf32> to vector<8x8xf32>
    %46 = arith.mulf %43, %45 : vector<8x8xf32>
    %47 = arith.addf %41, %46 : vector<8x8xf32>
    %48 = arith.negf %47 : vector<8x8xf32>
    %49 = math.exp %48 : vector<8x8xf32>
    %cst_14 = arith.constant 1.000000e+00 : f32
    %50 = vector.broadcast %cst_14 : f32 to vector<8x8xf32>
    %51 = arith.addf %50, %49 : vector<8x8xf32>
    %52 = arith.divf %50, %51 : vector<8x8xf32>
    %53 = arith.addf %27, %52 : vector<8x8xf32>
    %cst_15 = arith.constant dense<0xFF800000> : vector<8xf32>
    %54 = vector.multi_reduction <maximumf>, %53, %cst_15 [1] : vector<8x8xf32> to vector<8xf32>
    %55 = vector.shape_cast %54 : vector<8xf32> to vector<8x1xf32>
    %56 = vector.broadcast %55 : vector<8x1xf32> to vector<8x8xf32>
    %57 = arith.subf %53, %56 : vector<8x8xf32>
    %58 = math.exp %57 : vector<8x8xf32>
    %cst_16 = arith.constant dense<0.000000e+00> : vector<8xf32>
    %59 = vector.multi_reduction <add>, %58, %cst_16 [1] : vector<8x8xf32> to vector<8xf32>
    %60 = vector.shape_cast %59 : vector<8xf32> to vector<8x1xf32>
    %61 = vector.broadcast %60 : vector<8x1xf32> to vector<8x8xf32>
    %62 = arith.divf %58, %61 : vector<8x8xf32>
    %c0_17 = arith.constant 0 : index
    %c0_18 = arith.constant 0 : index
    %63 = vector.load %arg8[%c0_17, %c0_18] : memref<8x8xf32, #tpu.memory_space<vmem>>, vector<8x8xf32>
    tpu.vector_store %arg8[%c0_17, %c0_18], %62 {strides = array<i32>} : memref<8x8xf32, #tpu.memory_space<vmem>>, vector<8x8xf32>,
    %cst_19 = arith.constant dense<0.000000e+00> : vector<8xf32>
    %64 = vector.multi_reduction <add>, %62, %cst_19 [1] : vector<8x8xf32> to vector<8xf32>
    %65 = vector.shape_cast %64 : vector<8xf32> to vector<8x1xf32>
    %cst_20 = arith.constant 1.000000e+00 : f32
    %66 = vector.broadcast %cst_20 : f32 to vector<8x1xf32>
    %67 = arith.addf %66, %65 : vector<8x1xf32>
    %c0_21 = arith.constant 0 : index
    %c0_22 = arith.constant 0 : index
    %68 = vector.load %arg1[%c0_21, %c0_22] : memref<64x10xf32, #tpu.memory_space<vmem>>, vector<64x10xf32>
    %c0_23 = arith.constant 0 : index
    %c0_24 = arith.constant 0 : index
    %69 = vector.load %arg0[%c0_23, %c0_24] : memref<256x128xf32, #tpu.memory_space<vmem>>, vector<10x128xf32>
    %c16 = arith.constant 16 : index
    %c0_25 = arith.constant 0 : index
    %70 = vector.load %arg0[%c16, %c0_25] : memref<256x128xf32, #tpu.memory_space<vmem>>, vector<1x128xf32>
    %cst_26 = arith.constant dense<0.000000e+00> : vector<64x128xf32>
    %71 = tpu.matmul %68, %69, %cst_26 {dimension_numbers = #tpu.dot_dimension_numbers<[1], [0], [0], [1], [0, 0, 1, 1], [], []>} : vector<64x10xf32>, vector<10x128xf32>, vector<64x128xf32> -> vector<64x128xf32>
    %72 = vector.broadcast %70 : vector<1x128xf32> to vector<64x128xf32>
    %73 = arith.addf %71, %72 : vector<64x128xf32>
    %cst_27 = arith.constant 0.000000e+00 : f32
    %74 = vector.broadcast %cst_27 : f32 to vector<64x128xf32>
    %75 = arith.cmpf ogt, %73, %74 : vector<64x128xf32>
    %cst_28 = arith.constant 0.00999999977 : f32
    %76 = vector.broadcast %cst_28 : f32 to vector<64x128xf32>
    %77 = arith.mulf %76, %73 : vector<64x128xf32>
    %78 = arith.select %75, %73, %77 : vector<64x128xi1>, vector<64x128xf32>
    %c24 = arith.constant 24 : index
    %c0_29 = arith.constant 0 : index
    %79 = vector.load %arg0[%c24, %c0_29] : memref<256x128xf32, #tpu.memory_space<vmem>>, vector<64x128xf32>
    %c88 = arith.constant 88 : index
    %c0_30 = arith.constant 0 : index
    %80 = vector.load %arg0[%c88, %c0_30] : memref<256x128xf32, #tpu.memory_space<vmem>>, vector<1x128xf32>
    %81 = vector.extract_strided_slice %78 {offsets = [0, 0], sizes = [64, 64], strides = [1, 1]} : vector<64x128xf32> to vector<64x64xf32>
    %cst_31 = arith.constant dense<0.000000e+00> : vector<64x128xf32>
    %82 = tpu.matmul %81, %79, %cst_31 {dimension_numbers = #tpu.dot_dimension_numbers<[1], [0], [0], [1], [0, 0, 1, 1], [], []>} : vector<64x64xf32>, vector<64x128xf32>, vector<64x128xf32> -> vector<64x128xf32>
    %83 = vector.broadcast %80 : vector<1x128xf32> to vector<64x128xf32>
    %84 = arith.addf %82, %83 : vector<64x128xf32>
    %85 = vector.extract_strided_slice %84 {offsets = [0, 0], sizes = [64, 10], strides = [1, 1]} : vector<64x128xf32> to vector<64x10xf32>
    %86 = arith.negf %85 : vector<64x10xf32>
    %87 = math.exp %86 : vector<64x10xf32>
    %cst_32 = arith.constant 1.000000e+00 : f32
    %88 = vector.broadcast %cst_32 : f32 to vector<64x10xf32>
    %89 = arith.addf %88, %87 : vector<64x10xf32>
    %90 = arith.divf %88, %89 : vector<64x10xf32>
    %c232 = arith.constant 232 : index
    %c0_33 = arith.constant 0 : index
    %91 = vector.load %arg0[%c232, %c0_33] : memref<256x128xf32, #tpu.memory_space<vmem>>, vector<1x128xf32>
    %92 = vector.extract_strided_slice %91 {offsets = [0, 0], sizes = [1, 10], strides = [1, 1]} : vector<1x128xf32> to vector<1x10xf32>
    %93 = vector.broadcast %92 : vector<1x10xf32> to vector<64x10xf32>
    %94 = arith.mulf %90, %93 : vector<64x10xf32>
    %c0_34 = arith.constant 0 : index
    %c0_35 = arith.constant 0 : index
    %95 = vector.load %arg5[%c0_34, %c0_35] : memref<64x10xf32, #tpu.memory_space<vmem>>, vector<64x10xf32>
    tpu.vector_store %arg5[%c0_34, %c0_35], %94 {strides = array<i32>} : memref<64x10xf32, #tpu.memory_space<vmem>>, vector<64x10xf32>,
    %c96 = arith.constant 96 : index
    %c0_36 = arith.constant 0 : index
    %96 = vector.load %arg0[%c96, %c0_36] : memref<256x128xf32, #tpu.memory_space<vmem>>, vector<10x128xf32>
    %c144 = arith.constant 144 : index
    %c0_37 = arith.constant 0 : index
    %97 = vector.load %arg0[%c144, %c0_37] : memref<256x128xf32, #tpu.memory_space<vmem>>, vector<1x128xf32>
    %98 = arith.mulf %94, %68 : vector<64x10xf32>
    %cst_38 = arith.constant dense<0.000000e+00> : vector<64x128xf32>
    %99 = tpu.matmul %98, %96, %cst_38 {dimension_numbers = #tpu.dot_dimension_numbers<[1], [0], [0], [1], [0, 0, 1, 1], [], []>} : vector<64x10xf32>, vector<10x128xf32>, vector<64x128xf32> -> vector<64x128xf32>
    %100 = vector.broadcast %97 : vector<1x128xf32> to vector<64x128xf32>
    %101 = arith.addf %99, %100 : vector<64x128xf32>
    %c112 = arith.constant 112 : index
    %c0_39 = arith.constant 0 : index
    %102 = vector.load %arg0[%c112, %c0_39] : memref<256x128xf32, #tpu.memory_space<vmem>>, vector<32x128xf32>
    %cst_40 = arith.constant 0.000000e+00 : f32
    %103 = vector.broadcast %cst_40 : f32 to vector<8x32xf32>
    %cst_41 = arith.constant 0.000000e+00 : f32
    %104 = vector.broadcast %cst_41 : f32 to vector<8x32xf32>
    %105 = vector.extract_strided_slice %101 {offsets = [0, 0], sizes = [8, 128], strides = [1, 1]} : vector<64x128xf32> to vector<8x128xf32>
    %cst_42 = arith.constant dense<0.000000e+00> : vector<8x128xf32>
    %106 = tpu.matmul %103, %102, %cst_42 {dimension_numbers = #tpu.dot_dimension_numbers<[1], [0], [0], [1], [0, 0, 1, 1], [], []>} : vector<8x32xf32>, vector<32x128xf32>, vector<8x128xf32> -> vector<8x128xf32>
    %107 = arith.addf %105, %106 : vector<8x128xf32>
    %108 = vector.extract_strided_slice %107 {offsets = [0, 0], sizes = [8, 96], strides = [1, 1]} : vector<8x128xf32> to vector<8x96xf32>
    %109 = arith.negf %108 : vector<8x96xf32>
    %110 = math.exp %109 : vector<8x96xf32>
    %cst_43 = arith.constant 1.000000e+00 : f32
    %111 = vector.broadcast %cst_43 : f32 to vector<8x96xf32>
    %112 = arith.addf %111, %110 : vector<8x96xf32>
    %113 = arith.divf %111, %112 : vector<8x96xf32>
    %114 = vector.extract_strided_slice %107 {offsets = [0, 96], sizes = [8, 32], strides = [1, 1]} : vector<8x128xf32> to vector<8x32xf32>
    %115 = math.tanh %114 : vector<8x32xf32>
    %116 = vector.extract_strided_slice %113 {offsets = [0, 32], sizes = [8, 32], strides = [1, 1]} : vector<8x96xf32> to vector<8x32xf32>
    %117 = arith.mulf %116, %104 : vector<8x32xf32>
    %118 = vector.extract_strided_slice %113 {offsets = [0, 0], sizes = [8, 32], strides = [1, 1]} : vector<8x96xf32> to vector<8x32xf32>
    %119 = arith.mulf %118, %115 : vector<8x32xf32>
    %120 = arith.addf %117, %119 : vector<8x32xf32>
    %121 = vector.extract_strided_slice %113 {offsets = [0, 64], sizes = [8, 32], strides = [1, 1]} : vector<8x96xf32> to vector<8x32xf32>
    %122 = math.tanh %120 : vector<8x32xf32>
    %123 = arith.mulf %121, %122 : vector<8x32xf32>
    %124 = vector.broadcast %67 : vector<8x1xf32> to vector<8x32xf32>
    %125 = arith.mulf %123, %124 : vector<8x32xf32>
    %c0_44 = arith.constant 0 : index
    %c0_45 = arith.constant 0 : index
    %126 = vector.load %arg9[%c0_44, %c0_45] : memref<64x32xf32, #tpu.memory_space<vmem>>, vector<8x32xf32>
    tpu.vector_store %arg9[%c0_44, %c0_45], %125 {strides = array<i32>} : memref<64x32xf32, #tpu.memory_space<vmem>>, vector<8x32xf32>,
    %127 = vector.extract_strided_slice %101 {offsets = [8, 0], sizes = [8, 128], strides = [1, 1]} : vector<64x128xf32> to vector<8x128xf32>
    %cst_46 = arith.constant dense<0.000000e+00> : vector<8x128xf32>
    %128 = tpu.matmul %123, %102, %cst_46 {dimension_numbers = #tpu.dot_dimension_numbers<[1], [0], [0], [1], [0, 0, 1, 1], [], []>} : vector<8x32xf32>, vector<32x128xf32>, vector<8x128xf32> -> vector<8x128xf32>
    %129 = arith.addf %127, %128 : vector<8x128xf32>
    %130 = vector.extract_strided_slice %129 {offsets = [0, 0], sizes = [8, 96], strides = [1, 1]} : vector<8x128xf32> to vector<8x96xf32>
    %131 = arith.negf %130 : vector<8x96xf32>
    %132 = math.exp %131 : vector<8x96xf32>
    %cst_47 = arith.constant 1.000000e+00 : f32
    %133 = vector.broadcast %cst_47 : f32 to vector<8x96xf32>
    %134 = arith.addf %133, %132 : vector<8x96xf32>
    %135 = arith.divf %133, %134 : vector<8x96xf32>
    %136 = vector.extract_strided_slice %129 {offsets = [0, 96], sizes = [8, 32], strides = [1, 1]} : vector<8x128xf32> to vector<8x32xf32>
    %137 = math.tanh %136 : vector<8x32xf32>
    %138 = vector.extract_strided_slice %135 {offsets = [0, 32], sizes = [8, 32], strides = [1, 1]} : vector<8x96xf32> to vector<8x32xf32>
    %139 = arith.mulf %138, %120 : vector<8x32xf32>
    %140 = vector.extract_strided_slice %135 {offsets = [0, 0], sizes = [8, 32], strides = [1, 1]} : vector<8x96xf32> to vector<8x32xf32>
    %141 = arith.mulf %140, %137 : vector<8x32xf32>
    %142 = arith.addf %139, %141 : vector<8x32xf32>
    %143 = vector.extract_strided_slice %135 {offsets = [0, 64], sizes = [8, 32], strides = [1, 1]} : vector<8x96xf32> to vector<8x32xf32>
    %144 = math.tanh %142 : vector<8x32xf32>
    %145 = arith.mulf %143, %144 : vector<8x32xf32>
    %146 = vector.broadcast %67 : vector<8x1xf32> to vector<8x32xf32>
    %147 = arith.mulf %145, %146 : vector<8x32xf32>
    %c8 = arith.constant 8 : index
    %c0_48 = arith.constant 0 : index
    %148 = vector.load %arg9[%c8, %c0_48] : memref<64x32xf32, #tpu.memory_space<vmem>>, vector<8x32xf32>
    tpu.vector_store %arg9[%c8, %c0_48], %147 {strides = array<i32>} : memref<64x32xf32, #tpu.memory_space<vmem>>, vector<8x32xf32>,
    %149 = vector.extract_strided_slice %101 {offsets = [16, 0], sizes = [8, 128], strides = [1, 1]} : vector<64x128xf32> to vector<8x128xf32>
    %cst_49 = arith.constant dense<0.000000e+00> : vector<8x128xf32>
    %150 = tpu.matmul %145, %102, %cst_49 {dimension_numbers = #tpu.dot_dimension_numbers<[1], [0], [0], [1], [0, 0, 1, 1], [], []>} : vector<8x32xf32>, vector<32x128xf32>, vector<8x128xf32> -> vector<8x128xf32>
    %151 = arith.addf %149, %150 : vector<8x128xf32>
    %152 = vector.extract_strided_slice %151 {offsets = [0, 0], sizes = [8, 96], strides = [1, 1]} : vector<8x128xf32> to vector<8x96xf32>
    %153 = arith.negf %152 : vector<8x96xf32>
    %154 = math.exp %153 : vector<8x96xf32>
    %cst_50 = arith.constant 1.000000e+00 : f32
    %155 = vector.broadcast %cst_50 : f32 to vector<8x96xf32>
    %156 = arith.addf %155, %154 : vector<8x96xf32>
    %157 = arith.divf %155, %156 : vector<8x96xf32>
    %158 = vector.extract_strided_slice %151 {offsets = [0, 96], sizes = [8, 32], strides = [1, 1]} : vector<8x128xf32> to vector<8x32xf32>
    %159 = math.tanh %158 : vector<8x32xf32>
    %160 = vector.extract_strided_slice %157 {offsets = [0, 32], sizes = [8, 32], strides = [1, 1]} : vector<8x96xf32> to vector<8x32xf32>
    %161 = arith.mulf %160, %142 : vector<8x32xf32>
    %162 = vector.extract_strided_slice %157 {offsets = [0, 0], sizes = [8, 32], strides = [1, 1]} : vector<8x96xf32> to vector<8x32xf32>
    %163 = arith.mulf %162, %159 : vector<8x32xf32>
    %164 = arith.addf %161, %163 : vector<8x32xf32>
    %165 = vector.extract_strided_slice %157 {offsets = [0, 64], sizes = [8, 32], strides = [1, 1]} : vector<8x96xf32> to vector<8x32xf32>
    %166 = math.tanh %164 : vector<8x32xf32>
    %167 = arith.mulf %165, %166 : vector<8x32xf32>
    %168 = vector.broadcast %67 : vector<8x1xf32> to vector<8x32xf32>
    %169 = arith.mulf %167, %168 : vector<8x32xf32>
    %c16_51 = arith.constant 16 : index
    %c0_52 = arith.constant 0 : index
    %170 = vector.load %arg9[%c16_51, %c0_52] : memref<64x32xf32, #tpu.memory_space<vmem>>, vector<8x32xf32>
    tpu.vector_store %arg9[%c16_51, %c0_52], %169 {strides = array<i32>} : memref<64x32xf32, #tpu.memory_space<vmem>>, vector<8x32xf32>,
    %171 = vector.extract_strided_slice %101 {offsets = [24, 0], sizes = [8, 128], strides = [1, 1]} : vector<64x128xf32> to vector<8x128xf32>
    %cst_53 = arith.constant dense<0.000000e+00> : vector<8x128xf32>
    %172 = tpu.matmul %167, %102, %cst_53 {dimension_numbers = #tpu.dot_dimension_numbers<[1], [0], [0], [1], [0, 0, 1, 1], [], []>} : vector<8x32xf32>, vector<32x128xf32>, vector<8x128xf32> -> vector<8x128xf32>
    %173 = arith.addf %171, %172 : vector<8x128xf32>
    %174 = vector.extract_strided_slice %173 {offsets = [0, 0], sizes = [8, 96], strides = [1, 1]} : vector<8x128xf32> to vector<8x96xf32>
    %175 = arith.negf %174 : vector<8x96xf32>
    %176 = math.exp %175 : vector<8x96xf32>
    %cst_54 = arith.constant 1.000000e+00 : f32
    %177 = vector.broadcast %cst_54 : f32 to vector<8x96xf32>
    %178 = arith.addf %177, %176 : vector<8x96xf32>
    %179 = arith.divf %177, %178 : vector<8x96xf32>
    %180 = vector.extract_strided_slice %173 {offsets = [0, 96], sizes = [8, 32], strides = [1, 1]} : vector<8x128xf32> to vector<8x32xf32>
    %181 = math.tanh %180 : vector<8x32xf32>
    %182 = vector.extract_strided_slice %179 {offsets = [0, 32], sizes = [8, 32], strides = [1, 1]} : vector<8x96xf32> to vector<8x32xf32>
    %183 = arith.mulf %182, %164 : vector<8x32xf32>
    %184 = vector.extract_strided_slice %179 {offsets = [0, 0], sizes = [8, 32], strides = [1, 1]} : vector<8x96xf32> to vector<8x32xf32>
    %185 = arith.mulf %184, %181 : vector<8x32xf32>
    %186 = arith.addf %183, %185 : vector<8x32xf32>
    %187 = vector.extract_strided_slice %179 {offsets = [0, 64], sizes = [8, 32], strides = [1, 1]} : vector<8x96xf32> to vector<8x32xf32>
    %188 = math.tanh %186 : vector<8x32xf32>
    %189 = arith.mulf %187, %188 : vector<8x32xf32>
    %190 = vector.broadcast %67 : vector<8x1xf32> to vector<8x32xf32>
    %191 = arith.mulf %189, %190 : vector<8x32xf32>
    %c24_55 = arith.constant 24 : index
    %c0_56 = arith.constant 0 : index
    %192 = vector.load %arg9[%c24_55, %c0_56] : memref<64x32xf32, #tpu.memory_space<vmem>>, vector<8x32xf32>
    tpu.vector_store %arg9[%c24_55, %c0_56], %191 {strides = array<i32>} : memref<64x32xf32, #tpu.memory_space<vmem>>, vector<8x32xf32>,
    %193 = vector.extract_strided_slice %101 {offsets = [32, 0], sizes = [8, 128], strides = [1, 1]} : vector<64x128xf32> to vector<8x128xf32>
    %cst_57 = arith.constant dense<0.000000e+00> : vector<8x128xf32>
    %194 = tpu.matmul %189, %102, %cst_57 {dimension_numbers = #tpu.dot_dimension_numbers<[1], [0], [0], [1], [0, 0, 1, 1], [], []>} : vector<8x32xf32>, vector<32x128xf32>, vector<8x128xf32> -> vector<8x128xf32>
    %195 = arith.addf %193, %194 : vector<8x128xf32>
    %196 = vector.extract_strided_slice %195 {offsets = [0, 0], sizes = [8, 96], strides = [1, 1]} : vector<8x128xf32> to vector<8x96xf32>
    %197 = arith.negf %196 : vector<8x96xf32>
    %198 = math.exp %197 : vector<8x96xf32>
    %cst_58 = arith.constant 1.000000e+00 : f32
    %199 = vector.broadcast %cst_58 : f32 to vector<8x96xf32>
    %200 = arith.addf %199, %198 : vector<8x96xf32>
    %201 = arith.divf %199, %200 : vector<8x96xf32>
    %202 = vector.extract_strided_slice %195 {offsets = [0, 96], sizes = [8, 32], strides = [1, 1]} : vector<8x128xf32> to vector<8x32xf32>
    %203 = math.tanh %202 : vector<8x32xf32>
    %204 = vector.extract_strided_slice %201 {offsets = [0, 32], sizes = [8, 32], strides = [1, 1]} : vector<8x96xf32> to vector<8x32xf32>
    %205 = arith.mulf %204, %186 : vector<8x32xf32>
    %206 = vector.extract_strided_slice %201 {offsets = [0, 0], sizes = [8, 32], strides = [1, 1]} : vector<8x96xf32> to vector<8x32xf32>
    %207 = arith.mulf %206, %203 : vector<8x32xf32>
    %208 = arith.addf %205, %207 : vector<8x32xf32>
    %209 = vector.extract_strided_slice %201 {offsets = [0, 64], sizes = [8, 32], strides = [1, 1]} : vector<8x96xf32> to vector<8x32xf32>
    %210 = math.tanh %208 : vector<8x32xf32>
    %211 = arith.mulf %209, %210 : vector<8x32xf32>
    %212 = vector.broadcast %67 : vector<8x1xf32> to vector<8x32xf32>
    %213 = arith.mulf %211, %212 : vector<8x32xf32>
    %c32 = arith.constant 32 : index
    %c0_59 = arith.constant 0 : index
    %214 = vector.load %arg9[%c32, %c0_59] : memref<64x32xf32, #tpu.memory_space<vmem>>, vector<8x32xf32>
    tpu.vector_store %arg9[%c32, %c0_59], %213 {strides = array<i32>} : memref<64x32xf32, #tpu.memory_space<vmem>>, vector<8x32xf32>,
    %215 = vector.extract_strided_slice %101 {offsets = [40, 0], sizes = [8, 128], strides = [1, 1]} : vector<64x128xf32> to vector<8x128xf32>
    %cst_60 = arith.constant dense<0.000000e+00> : vector<8x128xf32>
    %216 = tpu.matmul %211, %102, %cst_60 {dimension_numbers = #tpu.dot_dimension_numbers<[1], [0], [0], [1], [0, 0, 1, 1], [], []>} : vector<8x32xf32>, vector<32x128xf32>, vector<8x128xf32> -> vector<8x128xf32>
    %217 = arith.addf %215, %216 : vector<8x128xf32>
    %218 = vector.extract_strided_slice %217 {offsets = [0, 0], sizes = [8, 96], strides = [1, 1]} : vector<8x128xf32> to vector<8x96xf32>
    %219 = arith.negf %218 : vector<8x96xf32>
    %220 = math.exp %219 : vector<8x96xf32>
    %cst_61 = arith.constant 1.000000e+00 : f32
    %221 = vector.broadcast %cst_61 : f32 to vector<8x96xf32>
    %222 = arith.addf %221, %220 : vector<8x96xf32>
    %223 = arith.divf %221, %222 : vector<8x96xf32>
    %224 = vector.extract_strided_slice %217 {offsets = [0, 96], sizes = [8, 32], strides = [1, 1]} : vector<8x128xf32> to vector<8x32xf32>
    %225 = math.tanh %224 : vector<8x32xf32>
    %226 = vector.extract_strided_slice %223 {offsets = [0, 32], sizes = [8, 32], strides = [1, 1]} : vector<8x96xf32> to vector<8x32xf32>
    %227 = arith.mulf %226, %208 : vector<8x32xf32>
    %228 = vector.extract_strided_slice %223 {offsets = [0, 0], sizes = [8, 32], strides = [1, 1]} : vector<8x96xf32> to vector<8x32xf32>
    %229 = arith.mulf %228, %225 : vector<8x32xf32>
    %230 = arith.addf %227, %229 : vector<8x32xf32>
    %231 = vector.extract_strided_slice %223 {offsets = [0, 64], sizes = [8, 32], strides = [1, 1]} : vector<8x96xf32> to vector<8x32xf32>
    %232 = math.tanh %230 : vector<8x32xf32>
    %233 = arith.mulf %231, %232 : vector<8x32xf32>
    %234 = vector.broadcast %67 : vector<8x1xf32> to vector<8x32xf32>
    %235 = arith.mulf %233, %234 : vector<8x32xf32>
    %c40 = arith.constant 40 : index
    %c0_62 = arith.constant 0 : index
    %236 = vector.load %arg9[%c40, %c0_62] : memref<64x32xf32, #tpu.memory_space<vmem>>, vector<8x32xf32>
    tpu.vector_store %arg9[%c40, %c0_62], %235 {strides = array<i32>} : memref<64x32xf32, #tpu.memory_space<vmem>>, vector<8x32xf32>,
    %237 = vector.extract_strided_slice %101 {offsets = [48, 0], sizes = [8, 128], strides = [1, 1]} : vector<64x128xf32> to vector<8x128xf32>
    %cst_63 = arith.constant dense<0.000000e+00> : vector<8x128xf32>
    %238 = tpu.matmul %233, %102, %cst_63 {dimension_numbers = #tpu.dot_dimension_numbers<[1], [0], [0], [1], [0, 0, 1, 1], [], []>} : vector<8x32xf32>, vector<32x128xf32>, vector<8x128xf32> -> vector<8x128xf32>
    %239 = arith.addf %237, %238 : vector<8x128xf32>
    %240 = vector.extract_strided_slice %239 {offsets = [0, 0], sizes = [8, 96], strides = [1, 1]} : vector<8x128xf32> to vector<8x96xf32>
    %241 = arith.negf %240 : vector<8x96xf32>
    %242 = math.exp %241 : vector<8x96xf32>
    %cst_64 = arith.constant 1.000000e+00 : f32
    %243 = vector.broadcast %cst_64 : f32 to vector<8x96xf32>
    %244 = arith.addf %243, %242 : vector<8x96xf32>
    %245 = arith.divf %243, %244 : vector<8x96xf32>
    %246 = vector.extract_strided_slice %239 {offsets = [0, 96], sizes = [8, 32], strides = [1, 1]} : vector<8x128xf32> to vector<8x32xf32>
    %247 = math.tanh %246 : vector<8x32xf32>
    %248 = vector.extract_strided_slice %245 {offsets = [0, 32], sizes = [8, 32], strides = [1, 1]} : vector<8x96xf32> to vector<8x32xf32>
    %249 = arith.mulf %248, %230 : vector<8x32xf32>
    %250 = vector.extract_strided_slice %245 {offsets = [0, 0], sizes = [8, 32], strides = [1, 1]} : vector<8x96xf32> to vector<8x32xf32>
    %251 = arith.mulf %250, %247 : vector<8x32xf32>
    %252 = arith.addf %249, %251 : vector<8x32xf32>
    %253 = vector.extract_strided_slice %245 {offsets = [0, 64], sizes = [8, 32], strides = [1, 1]} : vector<8x96xf32> to vector<8x32xf32>
    %254 = math.tanh %252 : vector<8x32xf32>
    %255 = arith.mulf %253, %254 : vector<8x32xf32>
    %256 = vector.broadcast %67 : vector<8x1xf32> to vector<8x32xf32>
    %257 = arith.mulf %255, %256 : vector<8x32xf32>
    %c48 = arith.constant 48 : index
    %c0_65 = arith.constant 0 : index
    %258 = vector.load %arg9[%c48, %c0_65] : memref<64x32xf32, #tpu.memory_space<vmem>>, vector<8x32xf32>
    tpu.vector_store %arg9[%c48, %c0_65], %257 {strides = array<i32>} : memref<64x32xf32, #tpu.memory_space<vmem>>, vector<8x32xf32>,
    %259 = vector.extract_strided_slice %101 {offsets = [56, 0], sizes = [8, 128], strides = [1, 1]} : vector<64x128xf32> to vector<8x128xf32>
    %cst_66 = arith.constant dense<0.000000e+00> : vector<8x128xf32>
    %260 = tpu.matmul %255, %102, %cst_66 {dimension_numbers = #tpu.dot_dimension_numbers<[1], [0], [0], [1], [0, 0, 1, 1], [], []>} : vector<8x32xf32>, vector<32x128xf32>, vector<8x128xf32> -> vector<8x128xf32>
    %261 = arith.addf %259, %260 : vector<8x128xf32>
    %262 = vector.extract_strided_slice %261 {offsets = [0, 0], sizes = [8, 96], strides = [1, 1]} : vector<8x128xf32> to vector<8x96xf32>
    %263 = arith.negf %262 : vector<8x96xf32>
    %264 = math.exp %263 : vector<8x96xf32>
    %cst_67 = arith.constant 1.000000e+00 : f32
    %265 = vector.broadcast %cst_67 : f32 to vector<8x96xf32>
    %266 = arith.addf %265, %264 : vector<8x96xf32>
    %267 = arith.divf %265, %266 : vector<8x96xf32>
    %268 = vector.extract_strided_slice %261 {offsets = [0, 96], sizes = [8, 32], strides = [1, 1]} : vector<8x128xf32> to vector<8x32xf32>
    %269 = math.tanh %268 : vector<8x32xf32>
    %270 = vector.extract_strided_slice %267 {offsets = [0, 32], sizes = [8, 32], strides = [1, 1]} : vector<8x96xf32> to vector<8x32xf32>
    %271 = arith.mulf %270, %252 : vector<8x32xf32>
    %272 = vector.extract_strided_slice %267 {offsets = [0, 0], sizes = [8, 32], strides = [1, 1]} : vector<8x96xf32> to vector<8x32xf32>
    %273 = arith.mulf %272, %269 : vector<8x32xf32>
    %274 = arith.addf %271, %273 : vector<8x32xf32>
    %275 = vector.extract_strided_slice %267 {offsets = [0, 64], sizes = [8, 32], strides = [1, 1]} : vector<8x96xf32> to vector<8x32xf32>
    %276 = math.tanh %274 : vector<8x32xf32>
    %277 = arith.mulf %275, %276 : vector<8x32xf32>
    %278 = vector.broadcast %67 : vector<8x1xf32> to vector<8x32xf32>
    %279 = arith.mulf %277, %278 : vector<8x32xf32>
    %c56 = arith.constant 56 : index
    %c0_68 = arith.constant 0 : index
    %280 = vector.load %arg9[%c56, %c0_68] : memref<64x32xf32, #tpu.memory_space<vmem>>, vector<8x32xf32>
    tpu.vector_store %arg9[%c56, %c0_68], %279 {strides = array<i32>} : memref<64x32xf32, #tpu.memory_space<vmem>>, vector<8x32xf32>,
    %c0_69 = arith.constant 0 : index
    %c0_70 = arith.constant 0 : index
    %281 = vector.load %arg6[%c0_69, %c0_70] : memref<8x32xf32, #tpu.memory_space<vmem>>, vector<8x32xf32>
    tpu.vector_store %arg6[%c0_69, %c0_70], %277 {strides = array<i32>} : memref<8x32xf32, #tpu.memory_space<vmem>>, vector<8x32xf32>,
    %c0_71 = arith.constant 0 : index
    %c0_72 = arith.constant 0 : index
    %282 = vector.load %arg7[%c0_71, %c0_72] : memref<8x32xf32, #tpu.memory_space<vmem>>, vector<8x32xf32>
    tpu.vector_store %arg7[%c0_71, %c0_72], %274 {strides = array<i32>} : memref<8x32xf32, #tpu.memory_space<vmem>>, vector<8x32xf32>,
    %c0_73 = arith.constant 0 : index
    %c0_74 = arith.constant 0 : index
    %283 = vector.load %arg9[%c0_73, %c0_74] : memref<64x32xf32, #tpu.memory_space<vmem>>, vector<64x32xf32>
    %c152 = arith.constant 152 : index
    %c0_75 = arith.constant 0 : index
    %284 = vector.load %arg0[%c152, %c0_75] : memref<256x128xf32, #tpu.memory_space<vmem>>, vector<32x128xf32>
    %c184 = arith.constant 184 : index
    %c0_76 = arith.constant 0 : index
    %285 = vector.load %arg0[%c184, %c0_76] : memref<256x128xf32, #tpu.memory_space<vmem>>, vector<1x128xf32>
    %cst_77 = arith.constant dense<0.000000e+00> : vector<64x128xf32>
    %286 = tpu.matmul %283, %284, %cst_77 {dimension_numbers = #tpu.dot_dimension_numbers<[1], [0], [0], [1], [0, 0, 1, 1], [], []>} : vector<64x32xf32>, vector<32x128xf32>, vector<64x128xf32> -> vector<64x128xf32>
    %287 = vector.broadcast %285 : vector<1x128xf32> to vector<64x128xf32>
    %288 = arith.addf %286, %287 : vector<64x128xf32>
    %cst_78 = arith.constant 0.000000e+00 : f32
    %289 = vector.broadcast %cst_78 : f32 to vector<64x128xf32>
    %290 = arith.cmpf ogt, %288, %289 : vector<64x128xf32>
    %cst_79 = arith.constant 0.00999999977 : f32
    %291 = vector.broadcast %cst_79 : f32 to vector<64x128xf32>
    %292 = arith.mulf %291, %288 : vector<64x128xf32>
    %293 = arith.select %290, %288, %292 : vector<64x128xi1>, vector<64x128xf32>
    %c192 = arith.constant 192 : index
    %c0_80 = arith.constant 0 : index
    %294 = vector.load %arg0[%c192, %c0_80] : memref<256x128xf32, #tpu.memory_space<vmem>>, vector<32x128xf32>
    %c224 = arith.constant 224 : index
    %c0_81 = arith.constant 0 : index
    %295 = vector.load %arg0[%c224, %c0_81] : memref<256x128xf32, #tpu.memory_space<vmem>>, vector<1x128xf32>
    %296 = vector.extract_strided_slice %293 {offsets = [0, 0], sizes = [64, 32], strides = [1, 1]} : vector<64x128xf32> to vector<64x32xf32>
    %cst_82 = arith.constant dense<0.000000e+00> : vector<64x128xf32>
    %297 = tpu.matmul %296, %294, %cst_82 {dimension_numbers = #tpu.dot_dimension_numbers<[1], [0], [0], [1], [0, 0, 1, 1], [], []>} : vector<64x32xf32>, vector<32x128xf32>, vector<64x128xf32> -> vector<64x128xf32>
    %298 = vector.broadcast %295 : vector<1x128xf32> to vector<64x128xf32>
    %299 = arith.addf %297, %298 : vector<64x128xf32>
    %300 = vector.extract_strided_slice %299 {offsets = [0, 0], sizes = [64, 1], strides = [1, 1]} : vector<64x128xf32> to vector<64x1xf32>
    %c0_83 = arith.constant 0 : index
    %c0_84 = arith.constant 0 : index
    %301 = vector.load %arg4[%c0_83, %c0_84] : memref<64x1xf32, #tpu.memory_space<vmem>>, vector<64x1xf32>
    tpu.vector_store %arg4[%c0_83, %c0_84], %300 {strides = array<i32>} : memref<64x1xf32, #tpu.memory_space<vmem>>, vector<64x1xf32>,
    return
  }
}

</mosaic_0001>

<bundles_post_ra>
// kernel: tpu_custom_call.1
= control target key start
LH: loop header
LB: loop body
LE: loop exit
PB: predicated region body
PF: predicated region fallthrough
CT: control target
= control target key end

     0   :  { %14 = vsyncpa [#allocation4], 0  ;;  %s3098_s0 = inlined_call_operand.hbm [shape: f32[256,128], index: 0, kind: input, shape index: {}]   ;;  %s3099_s1 = inlined_call_operand.vmem [shape: f32[64,10], index: 1, kind: input, shape index: {}]   ;;  %s3100_s2 = inlined_call_operand.vmem [shape: f32[8,7], index: 2, kind: input, shape index: {}]   ;;  %s3101_s3 = inlined_call_operand.vmem [shape: f32[3,8,8], index: 3, kind: input, shape index: {}]   ;;  %s3102_s4 = inlined_call_operand.vmem [shape: f32[64,1], index: 4, kind: output, shape index: {0}]   ;;  %s3103_s5 = inlined_call_operand.vmem [shape: f32[64,10], index: 5, kind: output, shape index: {1}]   ;;  %s3104_s6 = inlined_call_operand.hbm [shape: f32[8,32], index: 6, kind: output, shape index: {2}]   ;;  %s3105_s7 = inlined_call_operand.hbm [shape: f32[8,32], index: 7, kind: output, shape index: {3}]   ;;  %s3106_s8 = inlined_call_operand.hbm [shape: f32[8,8], index: 8, kind: output, shape index: {4}]  }
   0x1   :  { %15 = vsyncpa [#allocation5], 0 }
   0x2   :  { %16 = vsyncpa [#allocation8], 0  ;;  %s2624_s27 = smov [#allocation3]  }
   0x3   :  { %s22_s28 = sshll.u32 %s2624_s27, 4  ;;  %s23_s28 = int_to_ptr.vmem [resolvable:$true] %s22_s28 }
   0x4   :  { %s2546_s29 = scalar_lea.vmem %s23_s28, 4096  ;;  %p2551_p1 = scmp.lt.s32.totalorder %s23_s28, %s23_s28 }
   0x5   :  { %p2547_p0 = scmp.ne.s32.totalorder %s23_s28, %s2546_s29  ;;  %p2552_p2 = scmp.lt.s32.totalorder %s2546_s29, %s2546_s29 }
   0x7   :  { %p2553_p3 = por %p2552_p2, %p2551_p1 }
   0x9   :  { %p2554_p4 = pnand %p2553_p3, %p2547_p0 }
   0xb   :  { %2557 = shalt.err (!%p2554_p4)
}
   0xc   :  { %s2625_s30 = smov 128   ;;  %s2626_s9 = smov 8  }
   0xd   :  { %28 = dma.hbm_to_vmem [thread:$0]  %s3098_s0, 4096, %s23_s28, [#allocation4], %s2625_s30, %s2625_s30, %s2626_s9  }
   0xe   :  { %2618 = dma.done.wait [#allocation4], 4096  }
   0xf   :  { %2619 = vsyncadd [#allocation4], 4294963200  ;;  %v2627_v0 = vmov 0.0   ;;  %vm2628_vm0 = vmmov 0   ;;  %vm309_vm1 = vcmask 1041408   ;;  %vm284_vm2 = vcmask 80896  }
  0x10   :  { %2209 = vmatprep.subr.mxu0 %v2627_v0  ;;  %2211 = vmatprep.mubr.msk.f32.mxu0 %vm2628_vm0, %v2627_v0  ;;  %vm44_vm3 = vcmask 1046528   ;;  %v278_v1 = vld [vmem:[#allocation3 + $0x8] sm:$0x3]  ;;  %v277_v2 = vld [vmem:[#allocation3] sm:$0xff]  ;;  %vm40_vm4 = vcmask 56320   ;;  %v449_v7 = vld [vmem:[#allocation3 + $0x50] sm:$0xff] }
  0x11   :  { %v2693_v3 = vld [vmem:[%s3099_s1] sm:$0xff]  ;;  %2214 = vmatprep.subr.msk.mxu1 %vm309_vm1, %v278_v1  ;;  %v38_v4 = vld [vmem:[#allocation3 + $0xf0] sm:$0x7f]  ;;  %v2705_v6 = vld [vmem:[%s3099_s1 + $0x8] sm:$0xff]  ;;  %vm455_vm7 = vcmask 523264   ;;  %s2629_s19 = smov 32  }
  0x12   :  { %2218 = vmatprep.mubr.msk.f32.mxu1 %vm284_vm2, %v2693_v3  ;;  %v39_v5 = vld [vmem:[%s3100_s2] sm:$0xff]  ;;  %2215 = vmatpush3.msk.msra.mxu1 %vm309_vm1, %v278_v1  ;;  %v448_v8 = vld [vmem:[#allocation3 + $0x48] sm:$0xff]  ;;  %v446_v10 = vld [vmem:[#allocation3 + $0x38] sm:$0xff]  ;;  %vm805_vm14 = vcmask 261120   ;;  %s2633_s20 = smov 127   ;;  %s2634_s21 = smov 125  }
  0x13   :  { %2210 = vmatpush3.msk.msra.mxu0 %vm44_vm3, %v38_v4  ;;  %2216 = vmatprep.subr.mxu1 %v277_v2  ;;  %v447_v9 = vld [vmem:[#allocation3 + $0x40] sm:$0xff]  ;;  %v445_v11 = vld [vmem:[#allocation3 + $0x30] sm:$0xff]  ;;  %v444_v12 = vld [vmem:[#allocation3 + $0x28] sm:$0xff]  ;;  %vm252_vm15 = vcmask 64512   ;;  %s2636_s30 = smov [#allocation7]   ;;  %s2637_s10 = smov [#allocation6]  }
  0x14   :  { %2212 = vmatmul.mubr.msk.f32.vlgmr.msra.gmra.mxu0 %vm40_vm4, %v39_v5  ;;  %2217 = vmatpush3.msra.mxu1 %v277_v2  ;;  %v443_v13 = vld [vmem:[#allocation3 + $0x20] sm:$0xff]  ;;  %v442_v14 = vld [vmem:[#allocation3 + $0x18] sm:$0xff]  ;;  %v2712_v15 = vld [vmem:[%s3099_s1 + $0x10] sm:$0xff]  ;;  %s1999_s9 = sshll.u32 %s2636_s30, 4  ;;  %s1989_s11 = sshll.u32 %s2637_s10, 4  ;;  %s2000_s9 = int_to_ptr.vmem [resolvable:$true] %s1999_s9  ;;  %s1990_s11 = int_to_ptr.vmem [resolvable:$true] %s1989_s11 }
  0x15   :  { %2230 = vmatprep.subr.mxu0 %v449_v7  ;;  %2219 = vmatmul.mubr.msk.f32.vlgmr.msra.gmra.mxu1 %vm284_vm2, %v2705_v6  ;;  %v2717_v16 = vld [vmem:[%s3099_s1 + $0x18] sm:$0xff]  ;;  %v2722_v17 = vld [vmem:[%s3099_s1 + $0x20] sm:$0xff]  ;;  %v2734_v18 = vld [vmem:[%s3099_s1 + $0x28] sm:$0xff]  ;;  %s2558_s12 = scalar_lea.vmem %s2000_s9, 128  ;;  %p2563_p6 = scmp.lt.s32.totalorder %s2000_s9, %s2000_s9 }
  0x16   :  { %2231 = vmatpush3.msra.mxu0 %v449_v7  ;;  %2221 = vmatprep.mubr.msk.f32.mxu1 %vm284_vm2, %v2712_v15  ;;  %v2739_v19 = vld [vmem:[%s3099_s1 + $0x30] sm:$0xff]  ;;  %v2748_v20 = vld [vmem:[%s3099_s1 + $0x38] sm:$0xff]  ;;  %v655_v45 = vld [vmem:[#allocation3 + $0x68] sm:$0x3]  ;;  %p2559_p5 = scmp.ne.s32.totalorder %s2000_s9, %s2558_s12  ;;  %p2564_p7 = scmp.lt.s32.totalorder %s2558_s12, %s2558_s12 }
  0x17   :  { %2232 = vmatprep.subr.mxu0 %v448_v8  ;;  %v2036_v21 = vld [vmem:[#allocation3 + $0x10] ss:$0 sm:$0xff]  ;;  %v2757_v46 = vld [vmem:[#allocation3 + $0x88] sm:$0xff]  ;;  %v654_v47 = vld [vmem:[#allocation3 + $0x60] sm:$0xff]  ;;  %2258 = vmatprep.subr.msk.mxu1 %vm309_vm1, %v655_v45 }
  0x18   :  { %2233 = vmatpush3.msra.mxu0 %v448_v8  ;;  %2259 = vmatpush3.msk.msra.mxu1 %vm309_vm1, %v655_v45  ;;  %v2764_v55 = vld [vmem:[#allocation3 + $0x80] sm:$0xff]  ;;  %v2768_v58 = vld [vmem:[#allocation3 + $0x78] sm:$0xff]  ;;  %v2779_v61 = vld [vmem:[#allocation3 + $0x70] sm:$0xff]  ;;  %p2565_p8 = por %p2564_p7, %p2563_p6 }
  0x19   :  { %2234 = vmatprep.subr.mxu0 %v447_v9  ;;  %2222 = vmatmul.mubr.msk.f32.gmra.mxu1 %vm284_vm2, %v2717_v16  ;;  %v2046_v62 = vld [vmem:[#allocation3 + $0x58] ss:$0 sm:$0xff] }
  0x1a   :  { %2235 = vmatpush3.msra.mxu0 %v447_v9  ;;  %2224 = vmatprep.mubr.msk.f32.mxu1 %vm284_vm2, %v2722_v17  ;;  %p2566_p9 = pnand %p2565_p8, %p2559_p5 }
  0x1b   :  { %2236 = vmatprep.subr.mxu0 %v446_v10  ;;  %2260 = vmatprep.subr.mxu1 %v654_v47 }
  0x1c   :  { %2237 = vmatpush3.msra.mxu0 %v446_v10  ;;  %2261 = vmatpush3.msra.mxu1 %v654_v47 }
  0x1d   :  { %2238 = vmatprep.subr.mxu0 %v445_v11  ;;  %2225 = vmatmul.mubr.msk.f32.gmra.mxu1 %vm284_vm2, %v2734_v18 }
  0x1e   :  { %2239 = vmatpush3.msra.mxu0 %v445_v11  ;;  %2227 = vmatprep.mubr.msk.f32.mxu1 %vm284_vm2, %v2739_v19 }
  0x1f   :  { %2240 = vmatprep.subr.mxu0 %v444_v12  ;;  %2285 = vmatprep.subr.mxu1 %v2627_v0 }
  0x20   :  { %2241 = vmatpush3.msra.mxu0 %v444_v12  ;;  %v2794_v12 = vld [vmem:[#allocation3 + $0xe8] ss:$0 sm:$0xff] }
  0x21   :  { %2242 = vmatprep.subr.mxu0 %v443_v13  ;;  %2228 = vmatmul.mubr.msk.f32.gmra.mxu1 %vm284_vm2, %v2748_v20 }
  0x22   :  { %2243 = vmatpush3.msra.mxu0 %v443_v13 }
  0x23   :  { %2244 = vmatprep.subr.mxu0 %v442_v14 }
  0x24   :  { %2245 = vmatpush3.msra.mxu0 %v442_v14 }
  0x25   :  { %2274 = vmatprep.subr.mxu0 %v2627_v0 }
  0xd4   :  { %v2752_v22 = vpop.f32.mrf.mxu0 }
  0xd5   :  { %v2220_v23 = vpop.f32.mrf.mxu1 }
  0xd6   :  { %v2213_v24 = vpop.f32.mrf.mxu0  ;;  %v385_v25 = vadd.f32 %v2220_v23, %v2036_v21 }
  0xd7   :  { %v379_v26 = vpop.f32.mrf.mxu1 }
  0xd8   :  { %v380_v27 = vadd.f32 %v2036_v21, %v379_v26  ;;  %v427_v28 = vmul.f32 0.01, %v385_v25  ;;  %vm419_vm5 = vcmp.gt.f32.partialorder %v385_v25, 0.0 }
  0xd9   :  { %v2223_v32 = vpop.f32.mrf.mxu1 }
  0xda   :  { %vm418_vm6 = vcmp.gt.f32.partialorder %v380_v27, 0.0  ;;  %v426_v29 = vmul.f32 0.01, %v380_v27  ;;  %v435_v31 = vsel %vm419_vm5, %v385_v25, %v427_v28  ;;  %v395_v35 = vadd.f32 %v2223_v32, %v2036_v21 }
  0xdb   :  { %v389_v33 = vpop.f32.mrf.mxu1 }
  0xdc   :  { %v434_v30 = vsel %vm418_vm6, %v380_v27, %v426_v29  ;;  %v390_v34 = vadd.f32 %v2036_v21, %v389_v33  ;;  %v429_v38 = vmul.f32 0.01, %v395_v35  ;;  %vm421_vm9 = vcmp.gt.f32.partialorder %v395_v35, 0.0 }
  0xdd   :  { %2246 = vmatprep.mubr.msk.f32.mxu0 %vm455_vm7, %v434_v30  ;;  %v2226_v36 = vpop.f32.mrf.mxu1 }
  0xde   :  { %2247 = vmatmul.mubr.msk.f32.vlgmr.msra.gmra.mxu0 %vm455_vm7, %v435_v31  ;;  %v428_v37 = vmul.f32 0.01, %v390_v34  ;;  %vm420_vm8 = vcmp.gt.f32.partialorder %v390_v34, 0.0  ;;  %v405_v42 = vadd.f32 %v2226_v36, %v2036_v21  ;;  %v437_v44 = vsel %vm421_vm9, %v395_v35, %v429_v38 }
  0xdf   :  { %v399_v39 = vpop.f32.mrf.mxu1  ;;  %2275 = vmatpush3.msra.mxu0 %v2757_v46 }
  0xe0   :  { %v400_v40 = vadd.f32 %v2036_v21, %v399_v39  ;;  %v436_v41 = vsel %vm420_vm8, %v390_v34, %v428_v37  ;;  %vm423_vm11 = vcmp.gt.f32.partialorder %v405_v42, 0.0  ;;  %v431_v50 = vmul.f32 0.01, %v405_v42  ;;  %2276 = vmatprep.subr.mxu0 %v2627_v0 }
  0xe1   :  { %v2229_v43 = vpop.f32.mrf.mxu1  ;;  %2249 = vmatprep.mubr.msk.f32.mxu0 %vm455_vm7, %v436_v41  ;;  %2277 = vmatpush3.msra.mxu0 %v2764_v55 }
  0xe2   :  { %vm422_vm10 = vcmp.gt.f32.partialorder %v400_v40, 0.0  ;;  %v430_v48 = vmul.f32 0.01, %v400_v40  ;;  %v415_v49 = vadd.f32 %v2229_v43, %v2036_v21  ;;  %2250 = vmatmul.mubr.msk.f32.gmra.mxu0 %vm455_vm7, %v437_v44  ;;  %v439_v56 = vsel %vm423_vm11, %v405_v42, %v431_v50  ;;  %2278 = vmatprep.subr.mxu0 %v2627_v0 }
  0xe3   :  { %v409_v51 = vpop.f32.mrf.mxu1  ;;  %2279 = vmatpush3.msra.mxu0 %v2768_v58 }
  0xe4   :  { %vm425_vm12 = vcmp.gt.f32.partialorder %v415_v49, 0.0  ;;  %v433_v52 = vmul.f32 0.01, %v415_v49  ;;  %v410_v53 = vadd.f32 %v2036_v21, %v409_v51  ;;  %v438_v54 = vsel %vm422_vm10, %v400_v40, %v430_v48  ;;  %2280 = vmatprep.subr.mxu0 %v2627_v0 }
  0xe5   :  { %2252 = vmatprep.mubr.msk.f32.mxu0 %vm455_vm7, %v438_v54  ;;  %2281 = vmatpush3.msra.mxu0 %v2779_v61 }
  0xe6   :  { %vm424_vm13 = vcmp.gt.f32.partialorder %v410_v53, 0.0  ;;  %v432_v57 = vmul.f32 0.01, %v410_v53  ;;  %2253 = vmatmul.mubr.msk.f32.gmra.mxu0 %vm455_vm7, %v439_v56  ;;  %v441_v59 = vsel %vm425_vm12, %v415_v49, %v433_v52  ;;  %2296 = vmatprep.subr.mxu0 %v2627_v0 }
  0xe8   :  { %v440_v60 = vsel %vm424_vm13, %v410_v53, %v432_v57 }
  0xe9   :  { %2255 = vmatprep.mubr.msk.f32.mxu0 %vm455_vm7, %v440_v60 }
  0xea   :  { %2256 = vmatmul.mubr.msk.f32.gmra.mxu0 %vm455_vm7, %v441_v59 }
  0xeb   :  { %2282 = vmatprep.mubr.msk.f32.mxu0 %vm2628_vm0, %v2627_v0 }
  0xee   :  { %2283 = vmatmul.mubr.f32.vlgmr.msra.gmra.mxu0 %v2627_v0 }
  0xef   :  { %2297 = vmatpush3.msra.mxu0 %v2757_v46  ;;  %2304 = vmatprep.mubr.msk.f32.mxu0 %vm2628_vm0, %v2627_v0 }
  0xf0   :  { %2298 = vmatprep.subr.mxu0 %v2627_v0 }
  0xf1   :  { %2299 = vmatpush3.msra.mxu0 %v2764_v55 }
  0xf2   :  { %2300 = vmatprep.subr.mxu0 %v2627_v0 }
  0xf3   :  { %2301 = vmatpush3.msra.mxu0 %v2768_v58 }
  0xf4   :  { %2302 = vmatprep.subr.mxu0 %v2627_v0 }
  0xf5   :  { %2303 = vmatpush3.msra.mxu0 %v2779_v61 }
  0xf6   :  { %2318 = vmatprep.subr.mxu0 %v2627_v0 }
 0x19e   :  { %v2248_v63 = vpop.f32.mrf.mxu0 }
 0x19f   :  { %v552_v1 = vadd.f32 %v2248_v63, %v2046_v62 }
 0x1a0   :  { %v546_v2 = vpop.f32.mrf.mxu0 }
 0x1a1   :  { %v2056_v4 = vmul.f32 -1.442695, %v552_v1  ;;  %v547_v5 = vadd.f32 %v2046_v62, %v546_v2 }
 0x1a3   :  { %2426 = vpow2.f32 %v2056_v4  ;;  %v2055_v7 = vmul.f32 -1.442695, %v547_v5 }
 0x1a5   :  { %2428 = vpow2.f32 %v2055_v7 }
 0x1b0   :  { %v2427_v8 = vpop.eup %2426 }
 0x1b1   :  { %v610_v9 = vadd.f32 1.0, %v2427_v8 }
 0x1b2   :  { %v2429_v10 = vpop.eup %2428 }
 0x1b3   :  { %2430 = vrcp.f32 %v610_v9  ;;  %v609_v11 = vadd.f32 1.0, %v2429_v10 }
 0x1b5   :  { %2432 = vrcp.f32 %v609_v11 }
 0x1c0   :  { %v2431_v13 = vpop.eup %2430 }
 0x1c1   :  { %v639_v14 = vmul.f32 %v2431_v13, %v2794_v12 }
 0x1c2   :  { %v2433_v21 = vpop.eup %2432 }
 0x1c3   :  { %v638_v23 = vmul.f32 %v2433_v21, %v2794_v12  ;;  %647 = vst.msk [vmem:[%s3103_s5 + $0x8] sm:$0xff] %vm284_vm2, %v639_v14  ;;  %v658_v25 = vmul.f32 %v639_v14, %v2705_v6  ;;  %v2862_v14 = vld [vmem:[#allocation3 + $0x90] ss:$0 sm:$0xff] }
 0x1c5   :  { %646 = vst.msk [vmem:[%s3103_s5] sm:$0xff] %vm284_vm2, %v638_v23  ;;  %v657_v24 = vmul.f32 %v638_v23, %v2693_v3  ;;  %v2251_v3 = vpop.f32.mrf.mxu0 }
 0x1c6   :  { %v562_v6 = vadd.f32 %v2251_v3, %v2046_v62 }
 0x1c7   :  { %2262 = vmatprep.mubr.msk.f32.mxu1 %vm284_vm2, %v657_v24  ;;  %v556_v26 = vpop.f32.mrf.mxu0 }
 0x1c8   :  { %2263 = vmatmul.mubr.msk.f32.vlgmr.msra.gmra.mxu1 %vm284_vm2, %v658_v25  ;;  %v2058_v27 = vmul.f32 -1.442695, %v562_v6  ;;  %v557_v28 = vadd.f32 %v2046_v62, %v556_v26 }
 0x1c9   :  { %2286 = vmatpush3.msra.mxu1 %v2757_v46  ;;  %v2254_v29 = vpop.f32.mrf.mxu0 }
 0x1ca   :  { %2287 = vmatprep.subr.mxu1 %v2627_v0  ;;  %2434 = vpow2.f32 %v2058_v27  ;;  %v2057_v30 = vmul.f32 -1.442695, %v557_v28  ;;  %v572_v31 = vadd.f32 %v2254_v29, %v2046_v62 }
 0x1cb   :  { %2288 = vmatpush3.msra.mxu1 %v2764_v55  ;;  %v566_v32 = vpop.f32.mrf.mxu0 }
 0x1cc   :  { %2289 = vmatprep.subr.mxu1 %v2627_v0  ;;  %2436 = vpow2.f32 %v2057_v30  ;;  %v2060_v33 = vmul.f32 -1.442695, %v572_v31  ;;  %v567_v34 = vadd.f32 %v2046_v62, %v566_v32 }
 0x1cd   :  { %2290 = vmatpush3.msra.mxu1 %v2768_v58  ;;  %v2257_v35 = vpop.f32.mrf.mxu0 }
 0x1ce   :  { %2291 = vmatprep.subr.mxu1 %v2627_v0  ;;  %2438 = vpow2.f32 %v2060_v33  ;;  %v2059_v36 = vmul.f32 -1.442695, %v567_v34  ;;  %v582_v37 = vadd.f32 %v2257_v35, %v2046_v62 }
 0x1cf   :  { %2292 = vmatpush3.msra.mxu1 %v2779_v61  ;;  %v576_v38 = vpop.f32.mrf.mxu0 }
 0x1d0   :  { %2307 = vmatprep.subr.mxu1 %v2627_v0  ;;  %2440 = vpow2.f32 %v2059_v36  ;;  %v2062_v39 = vmul.f32 -1.442695, %v582_v37  ;;  %v577_v40 = vadd.f32 %v2046_v62, %v576_v38 }
 0x1d1   :  { %v875_v45 = vpop.f32.mrf.mxu0 }
 0x1d2   :  { %2442 = vpow2.f32 %v2062_v39  ;;  %v2061_v41 = vmul.f32 -1.442695, %v577_v40 }
 0x1d3   :  { %v2284_v49 = vpop.f32.mrf.mxu0 }
 0x1d4   :  { %2444 = vpow2.f32 %v2061_v41 }
 0x1d7   :  { %v2435_v42 = vpop.eup %2434 }
 0x1d8   :  { %v612_v43 = vadd.f32 1.0, %v2435_v42 }
 0x1d9   :  { %v2437_v44 = vpop.eup %2436 }
 0x1da   :  { %v611_v47 = vadd.f32 1.0, %v2437_v44  ;;  %2446 = vrcp.f32 %v612_v43 }
 0x1db   :  { %v2439_v48 = vpop.eup %2438 }
 0x1dc   :  { %2448 = vrcp.f32 %v611_v47  ;;  %v614_v50 = vadd.f32 1.0, %v2439_v48 }
 0x1dd   :  { %v2441_v51 = vpop.eup %2440 }
 0x1de   :  { %v613_v52 = vadd.f32 1.0, %v2441_v51  ;;  %2450 = vrcp.f32 %v614_v50 }
 0x1df   :  { %v2443_v53 = vpop.eup %2442 }
 0x1e0   :  { %2452 = vrcp.f32 %v613_v52  ;;  %v616_v54 = vadd.f32 1.0, %v2443_v53 }
 0x1e1   :  { %v2445_v56 = vpop.eup %2444 }
 0x1e2   :  { %2454 = vrcp.f32 %v616_v54  ;;  %v615_v57 = vadd.f32 1.0, %v2445_v56 }
 0x1e4   :  { %2456 = vrcp.f32 %v615_v57 }
 0x1e7   :  { %v2447_v59 = vpop.eup %2446 }
 0x1e8   :  { %v641_v63 = vmul.f32 %v2447_v59, %v2794_v12 }
 0x1e9   :  { %v2449_v60 = vpop.eup %2448 }
 0x1ea   :  { %v640_v62 = vmul.f32 %v2449_v60, %v2794_v12  ;;  %649 = vst.msk [vmem:[%s3103_s5 + $0x18] sm:$0xff] %vm284_vm2, %v641_v63  ;;  %v660_v5 = vmul.f32 %v641_v63, %v2717_v16 }
 0x1eb   :  { %v2451_v1 = vpop.eup %2450 }
 0x1ec   :  { %648 = vst.msk [vmem:[%s3103_s5 + $0x10] sm:$0xff] %vm284_vm2, %v640_v62  ;;  %v659_v2 = vmul.f32 %v640_v62, %v2712_v15  ;;  %v643_v9 = vmul.f32 %v2451_v1, %v2794_v12 }
 0x1ed   :  { %v2453_v4 = vpop.eup %2452 }
 0x1ee   :  { %2265 = vmatprep.mubr.msk.f32.mxu1 %vm284_vm2, %v659_v2  ;;  %v642_v7 = vmul.f32 %v2453_v4, %v2794_v12  ;;  %651 = vst.msk [vmem:[%s3103_s5 + $0x28] sm:$0xff] %vm284_vm2, %v643_v9  ;;  %v662_v16 = vmul.f32 %v643_v9, %v2734_v18 }
 0x1ef   :  { %v2455_v8 = vpop.eup %2454  ;;  %2266 = vmatmul.mubr.msk.f32.gmra.mxu1 %vm284_vm2, %v660_v5 }
 0x1f0   :  { %650 = vst.msk [vmem:[%s3103_s5 + $0x20] sm:$0xff] %vm284_vm2, %v642_v7  ;;  %v661_v15 = vmul.f32 %v642_v7, %v2722_v17  ;;  %v645_v10 = vmul.f32 %v2455_v8, %v2794_v12 }
 0x1f1   :  { %v2457_v11 = vpop.eup %2456 }
 0x1f2   :  { %2268 = vmatprep.mubr.msk.f32.mxu1 %vm284_vm2, %v661_v15  ;;  %v644_v13 = vmul.f32 %v2457_v11, %v2794_v12  ;;  %653 = vst.msk [vmem:[%s3103_s5 + $0x38] sm:$0xff] %vm284_vm2, %v645_v10  ;;  %v664_v17 = vmul.f32 %v645_v10, %v2748_v20 }
 0x1f3   :  { %2269 = vmatmul.mubr.msk.f32.gmra.mxu1 %vm284_vm2, %v662_v16 }
 0x1f4   :  { %652 = vst.msk [vmem:[%s3103_s5 + $0x30] sm:$0xff] %vm284_vm2, %v644_v13  ;;  %v663_v18 = vmul.f32 %v644_v13, %v2739_v19  ;;  %s2630_s5 = smov 64  }
 0x1f6   :  { %2271 = vmatprep.mubr.msk.f32.mxu1 %vm284_vm2, %v663_v18 }
 0x1f7   :  { %2272 = vmatmul.mubr.msk.f32.gmra.mxu1 %vm284_vm2, %v664_v17 }
 0x1f8   :  { %2293 = vmatprep.mubr.msk.f32.mxu1 %vm2628_vm0, %v2627_v0 }
 0x288   :  { %v2264_v12 = vpop.f32.mrf.mxu1 }
 0x289   :  { %v768_v41 = vadd.f32 %v2264_v12, %v2862_v14 }
 0x28a   :  { %v762_v21 = vpop.f32.mrf.mxu1 }
 0x28b   :  { %v763_v20 = vadd.f32 %v2862_v14, %v762_v21 }
 0x28d   :  { %v879_v23 = vadd.f32 %v875_v45, %v763_v20 }
 0x28f   :  { %2458 = vtanh.f32 %v879_v23  ;;  %v2074_v19 = vmul.f32 -1.442695, %v879_v23 }
 0x291   :  { %2460 = vpow2.f32 %v2074_v19 }
 0x29c   :  { %v2459_v24 = vpop.eup %2458 }
 0x29d   :  { %889 = vrot.lane.b32.xlu0 %v2459_v24, %s2629_s19 }
 0x29e   :  { %v2461_v25 = vpop.eup %2460 }
 0x29f   :  { %v883_v3 = vadd.f32 1.0, %v2461_v25 }
 0x2a1   :  { %2462 = vrcp.f32 %v883_v3 }
 0x2ae   :  { %v2463_v6 = vpop.eup %2462 }
 0x2af   :  { %v887_v28 = vmul.f32 0.0, %v2463_v6  ;;  %v2883_v35 = vpop.f32.mrf.mxu1 }
 0x2b0   :  { %v778_v23 = vadd.f32 %v2883_v35, %v2862_v14 }
 0x2b1   :  { %v772_v36 = vpop.f32.mrf.mxu1 }
 0x2b2   :  { %v773_v63 = vadd.f32 %v2862_v14, %v772_v36 }
 0x2b3   :  { %v2885_v37 = vpop.f32.mrf.mxu1 }
 0x2b5   :  { %v2887_v38 = vpop.f32.mrf.mxu1 }
 0x2b7   :  { %v2889_v39 = vpop.f32.mrf.mxu1 }
 0x2b9   :  { %v2891_v40 = vpop.f32.mrf.mxu1 }
 0x30f   :  { %v890_v26 = vpop.permute.xlu0 %889 }
 0x310   :  { %v892_v27 = vmul.f32 %v2463_v6, %v890_v26 }
 0x312   :  { %894 = vrot.lane.b32.xlu0 %v892_v27, %s2629_s19 }
 0x384   :  { %v895_v29 = vpop.permute.xlu0 %894 }
 0x385   :  { %v897_v30 = vadd.f32 %v895_v29, %v887_v28 }
 0x387   :  { %2464 = vtanh.f32 %v897_v30 }
 0x394   :  { %v2465_v31 = vpop.eup %2464 }
 0x395   :  { %900 = vrot.lane.b32.xlu1 %v2465_v31, %s2629_s19 }
 0x407   :  { %v901_v32 = vpop.permute.xlu1 %900 }
 0x408   :  { %v2868_v33 = vmul.f32 %v2463_v6, %v901_v32 }
 0x40a   :  { %911 = vrot.lane.b32.xlu1 %v2868_v33, %s2630_s5 }
 0x47c   :  { %v912_v34 = vpop.permute.xlu1 %911 }
 0x47d   :  { %2294 = vmatmul.mubr.msk.f32.vlgmr.msra.gmra.mxu1 %vm805_vm14, %v912_v34 }
 0x47e   :  { %2308 = vmatpush3.msra.mxu1 %v2757_v46  ;;  %2315 = vmatprep.mubr.msk.f32.mxu1 %vm2628_vm0, %v2627_v0 }
 0x47f   :  { %2309 = vmatprep.subr.mxu1 %v2627_v0 }
 0x480   :  { %2310 = vmatpush3.msra.mxu1 %v2764_v55 }
 0x481   :  { %2311 = vmatprep.subr.mxu1 %v2627_v0 }
 0x482   :  { %2312 = vmatpush3.msra.mxu1 %v2768_v58 }
 0x483   :  { %2313 = vmatprep.subr.mxu1 %v2627_v0 }
 0x484   :  { %2314 = vmatpush3.msra.mxu1 %v2779_v61 }
 0x485   :  { %2329 = vmatprep.subr.mxu1 %v2627_v0 }
 0x53d   :  { %v981_v42 = vpop.f32.mrf.mxu1 }
 0x53e   :  { %v985_v43 = vadd.f32 %v981_v42, %v768_v41 }
 0x53f   :  { %v2295_v44 = vpop.f32.mrf.mxu1 }
 0x540   :  { %2466 = vtanh.f32 %v985_v43  ;;  %v2076_v47 = vmul.f32 -1.442695, %v985_v43  ;;  %v783_v43 = vadd.f32 %v2862_v14, %v2887_v38 }
 0x542   :  { %2468 = vpow2.f32 %v2076_v47 }
 0x54d   :  { %v2467_v45 = vpop.eup %2466 }
 0x54e   :  { %995 = vrot.lane.b32.xlu0 %v2467_v45, %s2629_s19 }
 0x54f   :  { %v2469_v48 = vpop.eup %2468 }
 0x550   :  { %v989_v49 = vadd.f32 1.0, %v2469_v48 }
 0x552   :  { %2470 = vrcp.f32 %v989_v49 }
 0x55f   :  { %v2471_v50 = vpop.eup %2470 }
 0x560   :  { %v993_v53 = vmul.f32 %v2471_v50, %v897_v30 }
 0x5c0   :  { %v996_v51 = vpop.permute.xlu0 %995 }
 0x5c1   :  { %v998_v52 = vmul.f32 %v2471_v50, %v996_v51 }
 0x5c3   :  { %1000 = vrot.lane.b32.xlu1 %v998_v52, %s2629_s19 }
 0x635   :  { %v1001_v54 = vpop.permute.xlu1 %1000 }
 0x636   :  { %v1003_v56 = vadd.f32 %v1001_v54, %v993_v53 }
 0x638   :  { %2472 = vtanh.f32 %v1003_v56 }
 0x645   :  { %v2473_v57 = vpop.eup %2472 }
 0x646   :  { %1006 = vrot.lane.b32.xlu0 %v2473_v57, %s2629_s19 }
 0x6b8   :  { %v1007_v59 = vpop.permute.xlu0 %1006 }
 0x6b9   :  { %v2897_v60 = vmul.f32 %v2471_v50, %v1007_v59 }
 0x6bb   :  { %1017 = vrot.lane.b32.xlu1 %v2897_v60, %s2630_s5 }
 0x72d   :  { %v1018_v62 = vpop.permute.xlu1 %1017 }
 0x72e   :  { %2305 = vmatmul.mubr.msk.f32.vlgmr.msra.gmra.mxu0 %vm805_vm14, %v1018_v62 }
 0x72f   :  { %2319 = vmatpush3.msra.mxu0 %v2757_v46  ;;  %2326 = vmatprep.mubr.msk.f32.mxu0 %vm2628_vm0, %v2627_v0 }
 0x730   :  { %2320 = vmatprep.subr.mxu0 %v2627_v0 }
 0x731   :  { %2321 = vmatpush3.msra.mxu0 %v2764_v55 }
 0x732   :  { %2322 = vmatprep.subr.mxu0 %v2627_v0 }
 0x733   :  { %2323 = vmatpush3.msra.mxu0 %v2768_v58 }
 0x734   :  { %2324 = vmatprep.subr.mxu0 %v2627_v0 }
 0x735   :  { %2325 = vmatpush3.msra.mxu0 %v2779_v61 }
 0x736   :  { %2340 = vmatprep.subr.mxu0 %v2627_v0 }
 0x7ee   :  { %v1087_v1 = vpop.f32.mrf.mxu0 }
 0x7ef   :  { %v1091_v2 = vadd.f32 %v1087_v1, %v773_v63 }
 0x7f0   :  { %v2306_v4 = vpop.f32.mrf.mxu0 }
 0x7f1   :  { %2474 = vtanh.f32 %v1091_v2  ;;  %v2078_v7 = vmul.f32 -1.442695, %v1091_v2  ;;  %v788_v2 = vadd.f32 %v2885_v37, %v2862_v14 }
 0x7f3   :  { %2476 = vpow2.f32 %v2078_v7 }
 0x7fe   :  { %v2475_v5 = vpop.eup %2474 }
 0x7ff   :  { %1101 = vrot.lane.b32.xlu0 %v2475_v5, %s2629_s19 }
 0x800   :  { %v2477_v8 = vpop.eup %2476 }
 0x801   :  { %v1095_v9 = vadd.f32 1.0, %v2477_v8 }
 0x803   :  { %2478 = vrcp.f32 %v1095_v9 }
 0x810   :  { %v2479_v15 = vpop.eup %2478 }
 0x811   :  { %v1099_v16 = vmul.f32 %v2479_v15, %v1003_v56 }
 0x871   :  { %v1102_v10 = vpop.permute.xlu0 %1101 }
 0x872   :  { %v1104_v11 = vmul.f32 %v2479_v15, %v1102_v10 }
 0x874   :  { %1106 = vrot.lane.b32.xlu1 %v1104_v11, %s2629_s19 }
 0x8e6   :  { %v1107_v13 = vpop.permute.xlu1 %1106 }
 0x8e7   :  { %v1109_v17 = vadd.f32 %v1107_v13, %v1099_v16 }
 0x8e9   :  { %2480 = vtanh.f32 %v1109_v17 }
 0x8f6   :  { %v2481_v18 = vpop.eup %2480 }
 0x8f7   :  { %1112 = vrot.lane.b32.xlu0 %v2481_v18, %s2629_s19  ;;  %v793_v18 = vadd.f32 %v2862_v14, %v2891_v40 }
 0x969   :  { %v1113_v12 = vpop.permute.xlu0 %1112 }
 0x96a   :  { %v2916_v21 = vmul.f32 %v2479_v15, %v1113_v12 }
 0x96c   :  { %1123 = vrot.lane.b32.xlu1 %v2916_v21, %s2630_s5 }
 0x9de   :  { %v1124_v20 = vpop.permute.xlu1 %1123 }
 0x9df   :  { %2316 = vmatmul.mubr.msk.f32.vlgmr.msra.gmra.mxu1 %vm805_vm14, %v1124_v20 }
 0x9e0   :  { %2330 = vmatpush3.msra.mxu1 %v2757_v46  ;;  %2337 = vmatprep.mubr.msk.f32.mxu1 %vm2628_vm0, %v2627_v0 }
 0x9e1   :  { %2331 = vmatprep.subr.mxu1 %v2627_v0 }
 0x9e2   :  { %2332 = vmatpush3.msra.mxu1 %v2764_v55 }
 0x9e3   :  { %2333 = vmatprep.subr.mxu1 %v2627_v0 }
 0x9e4   :  { %2334 = vmatpush3.msra.mxu1 %v2768_v58 }
 0x9e5   :  { %2335 = vmatprep.subr.mxu1 %v2627_v0 }
 0x9e6   :  { %2336 = vmatpush3.msra.mxu1 %v2779_v61 }
 0x9e7   :  { %2351 = vmatprep.subr.mxu1 %v2627_v0 }
 0xa9f   :  { %v1193_v24 = vpop.f32.mrf.mxu1 }
 0xaa0   :  { %v1197_v19 = vadd.f32 %v1193_v24, %v778_v23 }
 0xaa1   :  { %v2317_v25 = vpop.f32.mrf.mxu1 }
 0xaa2   :  { %2482 = vtanh.f32 %v1197_v19  ;;  %v2080_v6 = vmul.f32 -1.442695, %v1197_v19 }
 0xaa4   :  { %2484 = vpow2.f32 %v2080_v6 }
 0xaaf   :  { %v2483_v3 = vpop.eup %2482 }
 0xab0   :  { %1207 = vrot.lane.b32.xlu0 %v2483_v3, %s2629_s19 }
 0xab1   :  { %v2485_v26 = vpop.eup %2484 }
 0xab2   :  { %v1201_v27 = vadd.f32 1.0, %v2485_v26 }
 0xab4   :  { %2486 = vrcp.f32 %v1201_v27 }
 0xac1   :  { %v2487_v28 = vpop.eup %2486 }
 0xac2   :  { %v1205_v31 = vmul.f32 %v2487_v28, %v1109_v17 }
 0xb22   :  { %v1208_v29 = vpop.permute.xlu0 %1207 }
 0xb23   :  { %v1210_v30 = vmul.f32 %v2487_v28, %v1208_v29 }
 0xb25   :  { %1212 = vrot.lane.b32.xlu1 %v1210_v30, %s2629_s19 }
 0xb97   :  { %v1213_v32 = vpop.permute.xlu1 %1212 }
 0xb98   :  { %v1215_v34 = vadd.f32 %v1213_v32, %v1205_v31  ;;  %v2632_v31 = vmov 2  }
 0xb99   :  { %2424 = vset.pattern.permute.xlu1 %v2632_v31 }
 0xb9a   :  { %2488 = vtanh.f32 %v1215_v34 }
 0xba7   :  { %v2489_v35 = vpop.eup %2488 }
 0xba8   :  { %1218 = vrot.lane.b32.xlu0 %v2489_v35, %s2629_s19 }
 0xc1a   :  { %v1219_v36 = vpop.permute.xlu0 %1218 }
 0xc1b   :  { %v2936_v41 = vmul.f32 %v2487_v28, %v1219_v36  ;;  %v2631_v28 = vmov 0  }
 0xc1c   :  { %2423 = vset.pattern.permute.xlu0 %v2631_v28 }
 0xc1d   :  { %1229 = vrot.lane.b32.xlu1 %v2936_v41, %s2630_s5 }
 0xc8f   :  { %v1230_v42 = vpop.permute.xlu1 %1229 }
 0xc90   :  { %2327 = vmatmul.mubr.msk.f32.vlgmr.msra.gmra.mxu0 %vm805_vm14, %v1230_v42  ;;  %v221_v42 = vld [vmem:[#allocation3 + $0xf8] sm:$0x7] }
 0xc91   :  { %2341 = vmatpush3.msra.mxu0 %v2757_v46  ;;  %2348 = vmatprep.mubr.msk.f32.mxu0 %vm2628_vm0, %v2627_v0  ;;  %2402 = vpush %v221_v42 }
 0xc92   :  { %2342 = vmatprep.subr.mxu0 %v2627_v0 }
 0xc93   :  { %2343 = vmatpush3.msra.mxu0 %v2764_v55 }
 0xc94   :  { %2344 = vmatprep.subr.mxu0 %v2627_v0 }
 0xc95   :  { %2345 = vmatpush3.msra.mxu0 %v2768_v58 }
 0xc96   :  { %2346 = vmatprep.subr.mxu0 %v2627_v0 }
 0xc97   :  { %2347 = vmatpush3.msra.mxu0 %v2779_v61 }
 0xcc2   :  { %s2403_s22 = spop %2402 }
 0xd50   :  { %v1299_v44 = vpop.f32.mrf.mxu0 }
 0xd51   :  { %v1303_v45 = vadd.f32 %v1299_v44, %v783_v43  ;;  %v231_v43 = vrot.slane %v221_v42, 1  ;;  %v239_v44 = vrot.slane %v221_v42, 2 }
 0xd52   :  { %v2328_v47 = vpop.f32.mrf.mxu0 }
 0xd53   :  { %2490 = vtanh.f32 %v1303_v45  ;;  %v2082_v49 = vmul.f32 -1.442695, %v1303_v45  ;;  %2404 = vpush %v231_v43 }
 0xd54   :  { %2406 = vpush %v239_v44 }
 0xd55   :  { %2492 = vpow2.f32 %v2082_v49 }
 0xd60   :  { %v2491_v48 = vpop.eup %2490 }
 0xd61   :  { %1313 = vrot.lane.b32.xlu0 %v2491_v48, %s2629_s19  ;;  %v158_v48 = vlaneseq }
 0xd62   :  { %v2493_v50 = vpop.eup %2492 }
 0xd63   :  { %v1307_v51 = vadd.f32 1.0, %v2493_v50  ;;  %v159_v49 = vshrl.u32 %v158_v48, 7  ;;  %v225_v50 = vstv %s2403_s22 }
 0xd65   :  { %2494 = vrcp.f32 %v1307_v51  ;;  %v2033_v51 = vld [vmem:[%s3101_s3 + $0x8] sm:$0xff] }
 0xd72   :  { %v2495_v52 = vpop.eup %2494 }
 0xd73   :  { %v1311_v56 = vmul.f32 %v2495_v52, %v1215_v34 }
 0xd84   :  { %s2405_s23 = spop %2404 }
 0xd85   :  { %s2407_s1 = spop %2406 }
 0xdd3   :  { %v1314_v53 = vpop.permute.xlu0 %1313 }
 0xdd4   :  { %v1316_v54 = vmul.f32 %v2495_v52, %v1314_v53 }
 0xdd6   :  { %1318 = vrot.lane.b32.xlu1 %v1316_v54, %s2629_s19 }
 0xe48   :  { %v1319_v57 = vpop.permute.xlu1 %1318 }
 0xe49   :  { %v1321_v38 = vadd.f32 %v1319_v57, %v1311_v56  ;;  %v160_v57 = vsub.s32 0, %v159_v49 }
 0xe4b   :  { %2496 = vtanh.f32 %v1321_v38 }
 0xe58   :  { %v2497_v59 = vpop.eup %2496 }
 0xe59   :  { %1324 = vrot.lane.b32.xlu0 %v2497_v59, %s2629_s19  ;;  %v241_v59 = vstv %s2407_s1 }
 0xecb   :  { %v1325_v62 = vpop.permute.xlu0 %1324 }
 0xecc   :  { %v2955_v63 = vmul.f32 %v2495_v52, %v1325_v62  ;;  %v233_v52 = vstv %s2405_s23 }
 0xecd   :  { %v235_v56 = vmul.f32 %v2033_v51, %v233_v52  ;;  %v1673_v52 = vld [vmem:[#allocation3 + $0xb0] sm:$0xff] }
 0xece   :  { %1335 = vrot.lane.b32.xlu1 %v2955_v63, %s2630_s5  ;;  %2362 = vmatprep.subr.mxu0 %v1673_v52 }
 0xf40   :  { %v1336_v1 = vpop.permute.xlu1 %1335 }
 0xf41   :  { %2338 = vmatmul.mubr.msk.f32.vlgmr.msra.gmra.mxu1 %vm805_vm14, %v1336_v1 }
 0xf42   :  { %2352 = vmatpush3.msra.mxu1 %v2757_v46  ;;  %2359 = vmatprep.mubr.msk.f32.mxu1 %vm2628_vm0, %v2627_v0 }
 0xf43   :  { %2353 = vmatprep.subr.mxu1 %v2627_v0 }
 0xf44   :  { %2354 = vmatpush3.msra.mxu1 %v2764_v55 }
 0xf45   :  { %2355 = vmatprep.subr.mxu1 %v2627_v0 }
 0xf46   :  { %2356 = vmatpush3.msra.mxu1 %v2768_v58 }
 0xf47   :  { %2357 = vmatprep.subr.mxu1 %v2627_v0 }
 0xf48   :  { %2358 = vmatpush3.msra.mxu1 %v2779_v61 }
0x1001   :  { %v1405_v4 = vpop.f32.mrf.mxu1 }
0x1002   :  { %v1409_v46 = vadd.f32 %v1405_v4, %v788_v2 }
0x1003   :  { %v2339_v5 = vpop.f32.mrf.mxu1 }
0x1004   :  { %2498 = vtanh.f32 %v1409_v46  ;;  %v2084_v8 = vmul.f32 -1.442695, %v1409_v46 }
0x1006   :  { %2500 = vpow2.f32 %v2084_v8 }
0x1011   :  { %v2499_v7 = vpop.eup %2498 }
0x1012   :  { %1419 = vrot.lane.b32.xlu0 %v2499_v7, %s2629_s19 }
0x1013   :  { %v2501_v55 = vpop.eup %2500 }
0x1014   :  { %v1413_v9 = vadd.f32 1.0, %v2501_v55 }
0x1016   :  { %2502 = vrcp.f32 %v1413_v9 }
0x1023   :  { %v2503_v58 = vpop.eup %2502 }
0x1024   :  { %v1417_v61 = vmul.f32 %v2503_v58, %v1321_v38  ;;  %v2034_v38 = vld [vmem:[%s3101_s3 + $0x10] sm:$0xff] }
0x1025   :  { %v243_v2 = vmul.f32 %v2034_v38, %v241_v59 }
0x1084   :  { %v1420_v15 = vpop.permute.xlu0 %1419 }
0x1085   :  { %v1422_v0 = vmul.f32 %v2503_v58, %v1420_v15 }
0x1087   :  { %1424 = vrot.lane.b32.xlu1 %v1422_v0, %s2629_s19 }
0x10f9   :  { %v1425_v10 = vpop.permute.xlu1 %1424 }
0x10fa   :  { %v1427_v37 = vadd.f32 %v1425_v10, %v1417_v61 }
0x10fc   :  { %2504 = vtanh.f32 %v1427_v37 }
0x1109   :  { %v2505_v11 = vpop.eup %2504 }
0x110a   :  { %1430 = vrot.lane.b32.xlu0 %v2505_v11, %s2629_s19 }
0x117c   :  { %v1431_v16 = vpop.permute.xlu0 %1430 }
0x117d   :  { %v2974_v13 = vmul.f32 %v2503_v58, %v1431_v16 }
0x117f   :  { %1441 = vrot.lane.b32.xlu1 %v2974_v13, %s2630_s5 }
0x11f1   :  { %v1442_v17 = vpop.permute.xlu1 %1441 }
0x11f2   :  { %2349 = vmatmul.mubr.msk.f32.vlgmr.msra.gmra.mxu0 %vm805_vm14, %v1442_v17 }
0x11f3   :  { %2363 = vmatpush3.msra.mxu0 %v1673_v52 }
0x12b2   :  { %v1511_v12 = vpop.f32.mrf.mxu0 }
0x12b3   :  { %v1515_v20 = vadd.f32 %v1511_v12, %v793_v18 }
0x12b4   :  { %v2350_v23 = vpop.f32.mrf.mxu0 }
0x12b5   :  { %2506 = vtanh.f32 %v1515_v20  ;;  %v2086_v19 = vmul.f32 -1.442695, %v1515_v20 }
0x12b7   :  { %2508 = vpow2.f32 %v2086_v19 }
0x12c2   :  { %v2507_v24 = vpop.eup %2506 }
0x12c3   :  { %1525 = vrot.lane.b32.xlu0 %v2507_v24, %s2629_s19 }
0x12c4   :  { %v2509_v25 = vpop.eup %2508 }
0x12c5   :  { %v1519_v3 = vadd.f32 1.0, %v2509_v25  ;;  %v798_v25 = vadd.f32 %v2889_v39, %v2862_v14 }
0x12c7   :  { %2510 = vrcp.f32 %v1519_v3 }
0x12d4   :  { %v2511_v6 = vpop.eup %2510 }
0x12d5   :  { %v1523_v40 = vmul.f32 %v2511_v6, %v1427_v37 }
0x1335   :  { %v1526_v26 = vpop.permute.xlu0 %1525 }
0x1336   :  { %v1528_v27 = vmul.f32 %v2511_v6, %v1526_v26 }
0x1338   :  { %1530 = vrot.lane.b32.xlu1 %v1528_v27, %s2629_s19 }
0x13aa   :  { %v1531_v29 = vpop.permute.xlu1 %1530 }
0x13ab   :  { %v2983_v30 = vadd.f32 %v1531_v29, %v1523_v40 }
0x13ad   :  { %2512 = vtanh.f32 %v2983_v30 }
0x13ba   :  { %v2513_v32 = vpop.eup %2512 }
0x13bb   :  { %1536 = vrot.lane.b32.xlu0 %v2513_v32, %s2629_s19 }
0x13bf   :  { %119 = vrot.lane.b32.xlu0 %v2752_v22, %s2633_s20 }
0x13c3   :  { %155 = vperm.xlu0 %2423, %v2752_v22  }
0x142d   :  { %v1537_v34 = vpop.permute.xlu0 %1536 }
0x142e   :  { %v2989_v35 = vmul.f32 %v2511_v6, %v1537_v34 }
0x1430   :  { %1547 = vrot.lane.b32.xlu1 %v2989_v35, %s2630_s5 }
0x1431   :  { %v120_v36 = vpop.permute.xlu0 %119 }
0x1434   :  { %170 = vrot.lane.b32.xlu1 %v2752_v22, %s2634_s21 }
0x1438   :  { %206 = vperm.xlu1 %2424, %v2752_v22   ;;  %v222_v22 = vld [vmem:[%s3101_s3] sm:$0xff]  ;;  %s2635_s3 = smov 96  }
0x1439   :  { %v227_v54 = vmul.f32 %v225_v50, %v222_v22 }
0x143b   :  { %v236_v1 = vadd.f32 %v235_v56, %v227_v54  ;;  %v1671_v54 = vld [vmem:[#allocation3 + $0xa0] sm:$0xff]  ;;  %v1670_v56 = vld [vmem:[#allocation3 + $0x98] sm:$0xff] }
0x143d   :  { %v244_v5 = vadd.f32 %v243_v2, %v236_v1 }
0x143e   :  { %v156_v46 = vpop.permute.xlu0 %155 }
0x143f   :  { %v2035_v8 = vmul.f32 -1.442695, %v244_v5 }
0x1441   :  { %2514 = vpow2.f32 %v2035_v8 }
0x144e   :  { %v2515_v61 = vpop.eup %2514 }
0x144f   :  { %v248_v37 = vadd.f32 1.0, %v2515_v61 }
0x1461   :  { %122 = vxpose.xlu1.b32.start.end [1/1] (short) (narrow) %v120_v36, 8 }
0x14a2   :  { %v1548_v45 = vpop.permute.xlu1 %1547 }
0x14a3   :  { %2360 = vmatmul.mubr.msk.f32.vlgmr.msra.gmra.mxu1 %vm805_vm14, %v1548_v45 }
0x14a6   :  { %v171_v47 = vpop.permute.xlu1 %170 }
0x14a7   :  { %173 = vxpose.xlu0.b32.start.end [1/1] (short) (narrow) %v171_v47, 8 }
0x14b3   :  { %v207_v53 = vpop.permute.xlu1 %206 }
0x14d0   :  { %2425 = vset.pattern.permute.xlu0 %v2632_v31 }
0x14dd   :  { %v138_v62 = vpop.trf.xlu1 }
0x14de   :  { %v161_v4 = vrot.slane %v138_v62, %v160_v57 }
0x14e0   :  { %v162_v7 = vadd.f32 %v161_v4, %v156_v46 }
0x14e2   :  { %v2031_v55 = vmul.f32 -1.442695, %v162_v7 }
0x14e4   :  { %2516 = vpow2.f32 %v2031_v55 }
0x14f1   :  { %v2517_v10 = vpop.eup %2516 }
0x14f2   :  { %v166_v11 = vadd.f32 1.0, %v2517_v10 }
0x1523   :  { %v189_v9 = vpop.trf.xlu0 }
0x1524   :  { %v212_v58 = vrot.slane %v189_v9, %v160_v57 }
0x1526   :  { %v213_v15 = vadd.f32 %v212_v58, %v207_v53  ;;  %v1672_v53 = vld [vmem:[#allocation3 + $0xa8] sm:$0xff] }
0x1527   :  { %2364 = vmatprep.subr.mxu0 %v1672_v53 }
0x1528   :  { %v2032_v0 = vmul.f32 -1.442695, %v213_v15  ;;  %2365 = vmatpush3.msra.mxu0 %v1672_v53 }
0x1529   :  { %2366 = vmatprep.subr.mxu0 %v1671_v54 }
0x152a   :  { %2518 = vpow2.f32 %v2032_v0  ;;  %2367 = vmatpush3.msra.mxu0 %v1671_v54 }
0x152b   :  { %2520 = vrcp.f32 %v248_v37  ;;  %2368 = vmatprep.subr.mxu0 %v1670_v56 }
0x152c   :  { %2522 = vrcp.f32 %v166_v11  ;;  %2369 = vmatpush3.msra.mxu0 %v1670_v56 }
0x1537   :  { %v2519_v16 = vpop.eup %2518 }
0x1538   :  { %v217_v17 = vadd.f32 1.0, %v2519_v16  ;;  %v2521_v18 = vpop.eup %2520 }
0x1539   :  { %v2523_v12 = vpop.eup %2522 }
0x153a   :  { %2524 = vrcp.f32 %v217_v17 }
0x1547   :  { %v2525_v20 = vpop.eup %2524 }
0x1548   :  { %v220_v23 = vadd.f32 %v2525_v20, %v2523_v12  ;;  %v1834_v12 = vld [vmem:[#allocation3 + $0xd0] sm:$0xff]  ;;  %v1833_v20 = vld [vmem:[#allocation3 + $0xc8] sm:$0xff] }
0x154a   :  { %v251_v24 = vadd.f32 %v2521_v18, %v220_v23  ;;  %v1835_v18 = vld [vmem:[#allocation3 + $0xd8] sm:$0xff]  ;;  %v1832_v23 = vld [vmem:[#allocation3 + $0xc0] sm:$0xff] }
0x154b   :  { %2382 = vmatprep.subr.mxu1 %v1835_v18 }
0x154c   :  { %v253_v19 = vsel %vm252_vm15, %v251_v24, -inf  ;;  %2383 = vmatpush3.msra.mxu1 %v1835_v18 }
0x154d   :  { %254 = vmax.xlane.f32.xlu0 %v253_v19  ;;  %2384 = vmatprep.subr.mxu1 %v1834_v12 }
0x154e   :  { %2385 = vmatpush3.msra.mxu1 %v1834_v12 }
0x154f   :  { %2386 = vmatprep.subr.mxu1 %v1833_v20 }
0x1550   :  { %2387 = vmatpush3.msra.mxu1 %v1833_v20 }
0x1551   :  { %2388 = vmatprep.subr.mxu1 %v1832_v23 }
0x1552   :  { %2389 = vmatpush3.msra.mxu1 %v1832_v23 }
0x1563   :  { %v1617_v3 = vpop.f32.mrf.mxu1 }
0x1564   :  { %v1621_v6 = vadd.f32 %v1617_v3, %v798_v25 }
0x1565   :  { %v2361_v26 = vpop.f32.mrf.mxu1 }
0x1566   :  { %2526 = vtanh.f32 %v1621_v6  ;;  %v2088_v28 = vmul.f32 -1.442695, %v1621_v6 }
0x1568   :  { %2528 = vpow2.f32 %v2088_v28 }
0x1573   :  { %v2527_v27 = vpop.eup %2526 }
0x1574   :  { %1631 = vrot.lane.b32.xlu1 %v2527_v27, %s2629_s19 }
0x1575   :  { %v2529_v40 = vpop.eup %2528 }
0x1576   :  { %v1625_v29 = vadd.f32 1.0, %v2529_v40 }
0x1578   :  { %2530 = vrcp.f32 %v1625_v29 }
0x1585   :  { %v2531_v36 = vpop.eup %2530 }
0x1586   :  { %v1629_v44 = vmul.f32 %v2531_v36, %v2983_v30 }
0x15d6   :  { %v255_v31 = vpop.xlane.xlu0 %254 }
0x15d7   :  { %v256_v32 = vsub.f32 %v251_v24, %v255_v31  ;;  %v2089_v24 = vld [vmem:[#allocation3 + $0xb8] ss:$0 sm:$0xff] }
0x15d9   :  { %v257_v34 = vmul.f32 1.442695, %v256_v32 }
0x15db   :  { %2532 = vpow2.f32 %v257_v34 }
0x15e6   :  { %v1632_v42 = vpop.permute.xlu1 %1631 }
0x15e7   :  { %v1634_v43 = vmul.f32 %v2531_v36, %v1632_v42 }
0x15e8   :  { %v2533_v14 = vpop.eup %2532 }
0x15e9   :  { %1636 = vrot.lane.b32.xlu0 %v1634_v43, %s2629_s19  ;;  %v259_v39 = vsel %vm252_vm15, %v2533_v14, 0.0 }
0x15ea   :  { %260 = vadd.xlane.f32.xlu1 %v259_v39 }
0x165b   :  { %v1637_v45 = vpop.permute.xlu0 %1636 }
0x165c   :  { %v1639_v47 = vadd.f32 %v1637_v45, %v1629_v44 }
0x165e   :  { %2534 = vtanh.f32 %v1639_v47 }
0x166b   :  { %v2535_v48 = vpop.eup %2534 }
0x166c   :  { %1642 = vrot.lane.b32.xlu1 %v2535_v48, %s2629_s19 }
0x1673   :  { %v261_v49 = vpop.xlane.xlu1 %260 }
0x1674   :  { %2536 = vrcp.f32 %v261_v49 }
0x1681   :  { %v2537_v22 = vpop.eup %2536 }
0x1682   :  { %v263_v50 = vmul.f32 %v2537_v22, %v2533_v14 }
0x1684   :  { %v265_v51 = vsel %vm252_vm15, %v263_v50, 0.0  ;;  %264 = vst.msk [vmem:[#allocation9] sm:$0xff] %vm252_vm15, %v263_v50 }
0x1685   :  { %266 = vadd.xlane.f32.xlu0 %v265_v51 }
0x16de   :  { %v1643_v62 = vpop.permute.xlu1 %1642 }
0x16df   :  { %v1645_v1 = vmul.f32 %v2531_v36, %v1643_v62 }
0x170e   :  { %v267_v30 = vpop.xlane.xlu0 %266 }
0x170f   :  { %v268_v57 = vadd.f32 1.0, %v267_v30 }
0x1711   :  { %v1116_v38 = vmul.f32 %v2916_v21, %v268_v57  ;;  %v904_v59 = vmul.f32 %v2868_v33, %v268_v57  ;;  %v1010_v2 = vmul.f32 %v2897_v60, %v268_v57  ;;  %v1222_v4 = vmul.f32 %v2936_v41, %v268_v57 }
0x1712   :  { %v1328_v33 = vmul.f32 %v2955_v63, %v268_v57  ;;  %v1434_v21 = vmul.f32 %v2974_v13, %v268_v57  ;;  %v1540_v46 = vmul.f32 %v2989_v35, %v268_v57  ;;  %v1646_v60 = vmul.f32 %v1645_v1, %v268_v57 }
0x1713   :  { %1118 = vrot.lane.b32.xlu0 %v1116_v38, %s2630_s5  ;;  %906 = vrot.lane.b32.xlu1 %v904_v59, %s2630_s5 }
0x1717   :  { %1012 = vrot.lane.b32.xlu1 %v1010_v2, %s2630_s5  ;;  %1653 = vrot.lane.b32.xlu0 %v1645_v1, %s2630_s5 }
0x171b   :  { %1224 = vrot.lane.b32.xlu1 %v1222_v4, %s2630_s5 }
0x171f   :  { %1330 = vrot.lane.b32.xlu1 %v1328_v33, %s2630_s5 }
0x1723   :  { %1436 = vrot.lane.b32.xlu1 %v1434_v21, %s2630_s5 }
0x1727   :  { %1542 = vrot.lane.b32.xlu1 %v1540_v46, %s2630_s5 }
0x172b   :  { %1648 = vrot.lane.b32.xlu1 %v1646_v60, %s2630_s5 }
0x172f   :  { %1658 = vrot.lane.b32.xlu1 %v1639_v47, %s2635_s3 }
0x1785   :  { %v1119_v41 = vpop.permute.xlu0 %1118  ;;  %v907_v5 = vpop.permute.xlu1 %906 }
0x1786   :  { %1121 = vst.msk [vmem:[#allocation2 + $0x10] sm:$0xff] %vm805_vm14, %v1119_v41  ;;  %909 = vst.msk [vmem:[#allocation2] sm:$0xff] %vm805_vm14, %v907_v5 }
0x1789   :  { %v1654_v63 = vpop.permute.xlu0 %1653  ;;  %v1013_v7 = vpop.permute.xlu1 %1012 }
0x178a   :  { %1656 = vst.msk [vmem:[#allocation6] sm:$0xff] %vm805_vm14, %v1654_v63  ;;  %1015 = vst.msk [vmem:[#allocation2 + $0x8] sm:$0xff] %vm805_vm14, %v1013_v7 }
0x178d   :  { %v1225_v13 = vpop.permute.xlu1 %1224  ;;  %v1662_v35 = vld [vmem:[#allocation2] sm:$0xff]  ;;  %v1664_v9 = vld [vmem:[#allocation2 + $0x10] sm:$0xff] }
0x178e   :  { %1227 = vst.msk [vmem:[#allocation2 + $0x18] sm:$0xff] %vm805_vm14, %v1225_v13  ;;  %2370 = vmatprep.mubr.msk.f32.mxu0 %vm805_vm14, %v1662_v35 }
0x1791   :  { %v1331_v8 = vpop.permute.xlu1 %1330  ;;  %v1663_v55 = vld [vmem:[#allocation2 + $0x8] sm:$0xff] }
0x1792   :  { %1333 = vst.msk [vmem:[#allocation2 + $0x20] sm:$0xff] %vm805_vm14, %v1331_v8  ;;  %2371 = vmatmul.mubr.msk.f32.vlgmr.msra.gmra.mxu0 %vm805_vm14, %v1663_v55 }
0x1793   :  { %2373 = vmatprep.mubr.msk.f32.mxu0 %vm805_vm14, %v1664_v9 }
0x1795   :  { %v1437_v58 = vpop.permute.xlu1 %1436  ;;  %v1665_v15 = vld [vmem:[#allocation2 + $0x18] sm:$0xff] }
0x1796   :  { %1439 = vst.msk [vmem:[#allocation2 + $0x28] sm:$0xff] %vm805_vm14, %v1437_v58  ;;  %2374 = vmatmul.mubr.msk.f32.gmra.mxu0 %vm805_vm14, %v1665_v15 }
0x1799   :  { %v1543_v0 = vpop.permute.xlu1 %1542  ;;  %v1666_v61 = vld [vmem:[#allocation2 + $0x20] sm:$0xff] }
0x179a   :  { %1545 = vst.msk [vmem:[#allocation2 + $0x30] sm:$0xff] %vm805_vm14, %v1543_v0  ;;  %2376 = vmatprep.mubr.msk.f32.mxu0 %vm805_vm14, %v1666_v61 }
0x179d   :  { %v1649_v10 = vpop.permute.xlu1 %1648  ;;  %v1667_v37 = vld [vmem:[#allocation2 + $0x28] sm:$0xff] }
0x179e   :  { %1651 = vst.msk [vmem:[#allocation2 + $0x38] sm:$0xff] %vm805_vm14, %v1649_v10  ;;  %2377 = vmatmul.mubr.msk.f32.gmra.mxu0 %vm805_vm14, %v1667_v37 }
0x17a1   :  { %v1659_v11 = vpop.permute.xlu1 %1658  ;;  %v1668_v16 = vld [vmem:[#allocation2 + $0x30] sm:$0xff] }
0x17a2   :  { %1661 = vst.msk [vmem:[#allocation7] sm:$0xff] %vm805_vm14, %v1659_v11  ;;  %2379 = vmatprep.mubr.msk.f32.mxu0 %vm805_vm14, %v1668_v16 }
0x17a5   :  { %v1669_v17 = vld [vmem:[#allocation2 + $0x38] sm:$0xff] }
0x17a6   :  { %2380 = vmatmul.mubr.msk.f32.gmra.mxu0 %vm805_vm14, %v1669_v17 }
0x1852   :  { %v2372_v19 = vpop.f32.mrf.mxu0 }
0x1853   :  { %v1775_v25 = vadd.f32 %v2372_v19, %v2089_v24 }
0x1854   :  { %v1769_v3 = vpop.f32.mrf.mxu0 }
0x1855   :  { %v1770_v6 = vadd.f32 %v2089_v24, %v1769_v3  ;;  %v1817_v26 = vmul.f32 0.01, %v1775_v25  ;;  %vm1809_vm0 = vcmp.gt.f32.partialorder %v1775_v25, 0.0 }
0x1856   :  { %v2375_v27 = vpop.f32.mrf.mxu0 }
0x1857   :  { %vm1808_vm1 = vcmp.gt.f32.partialorder %v1770_v6, 0.0  ;;  %v1816_v28 = vmul.f32 0.01, %v1770_v6  ;;  %v1785_v40 = vadd.f32 %v2375_v27, %v2089_v24  ;;  %v1825_v34 = vsel %vm1809_vm0, %v1775_v25, %v1817_v26 }
0x1858   :  { %v1779_v29 = vpop.f32.mrf.mxu0 }
0x1859   :  { %v1780_v31 = vadd.f32 %v2089_v24, %v1779_v29  ;;  %v1824_v32 = vsel %vm1808_vm1, %v1770_v6, %v1816_v28  ;;  %v1819_v36 = vmul.f32 0.01, %v1785_v40  ;;  %vm1811_vm2 = vcmp.gt.f32.partialorder %v1785_v40, 0.0 }
0x185a   :  { %2390 = vmatprep.mubr.msk.f32.mxu1 %vm805_vm14, %v1824_v32 }
0x185b   :  { %vm1810_vm3 = vcmp.gt.f32.partialorder %v1780_v31, 0.0  ;;  %v1818_v42 = vmul.f32 0.01, %v1780_v31  ;;  %2391 = vmatmul.mubr.msk.f32.vlgmr.msra.gmra.mxu1 %vm805_vm14, %v1825_v34  ;;  %v1827_v39 = vsel %vm1811_vm2, %v1785_v40, %v1819_v36 }
0x185d   :  { %v1826_v43 = vsel %vm1810_vm3, %v1780_v31, %v1818_v42 }
0x185e   :  { %v2378_v14 = vpop.f32.mrf.mxu0  ;;  %2393 = vmatprep.mubr.msk.f32.mxu1 %vm805_vm14, %v1826_v43 }
0x185f   :  { %v1795_v44 = vadd.f32 %v2378_v14, %v2089_v24  ;;  %2394 = vmatmul.mubr.msk.f32.gmra.mxu1 %vm805_vm14, %v1827_v39 }
0x1860   :  { %v1789_v45 = vpop.f32.mrf.mxu0 }
0x1861   :  { %v1790_v47 = vadd.f32 %v2089_v24, %v1789_v45  ;;  %v1821_v48 = vmul.f32 0.01, %v1795_v44  ;;  %vm1813_vm4 = vcmp.gt.f32.partialorder %v1795_v44, 0.0 }
0x1863   :  { %vm1812_vm5 = vcmp.gt.f32.partialorder %v1790_v47, 0.0  ;;  %v1820_v49 = vmul.f32 0.01, %v1790_v47  ;;  %v1829_v51 = vsel %vm1813_vm4, %v1795_v44, %v1821_v48 }
0x1865   :  { %v1828_v22 = vsel %vm1812_vm5, %v1790_v47, %v1820_v49 }
0x1866   :  { %v2381_v50 = vpop.f32.mrf.mxu0  ;;  %2396 = vmatprep.mubr.msk.f32.mxu1 %vm805_vm14, %v1828_v22 }
0x1867   :  { %v1805_v52 = vadd.f32 %v2381_v50, %v2089_v24  ;;  %2397 = vmatmul.mubr.msk.f32.gmra.mxu1 %vm805_vm14, %v1829_v51 }
0x1868   :  { %v1799_v53 = vpop.f32.mrf.mxu0 }
0x1869   :  { %v1800_v30 = vadd.f32 %v2089_v24, %v1799_v53  ;;  %v1823_v54 = vmul.f32 0.01, %v1805_v52  ;;  %vm1815_vm6 = vcmp.gt.f32.partialorder %v1805_v52, 0.0 }
0x186b   :  { %vm1814_vm7 = vcmp.gt.f32.partialorder %v1800_v30, 0.0  ;;  %v1822_v56 = vmul.f32 0.01, %v1800_v30  ;;  %v1831_v38 = vsel %vm1815_vm6, %v1805_v52, %v1823_v54 }
0x186d   :  { %v1830_v57 = vsel %vm1814_vm7, %v1800_v30, %v1822_v56 }
0x186e   :  { %2399 = vmatprep.mubr.msk.f32.mxu1 %vm805_vm14, %v1830_v57 }
0x186f   :  { %2400 = vmatmul.mubr.msk.f32.gmra.mxu1 %vm805_vm14, %v1831_v38 }
0x1870   :  { %2569 = shalt.err (!%p2566_p9)
}
0x1871   :  { %2002 = dma.vmem_to_hbm [thread:$0]  %s2000_s9, 128, %s3105_s7, [#allocation8]  }
0x1872   :  { %s2578_s14 = scalar_lea.vmem %s1990_s11, 128  ;;  %p2583_p11 = scmp.lt.s32.totalorder %s1990_s11, %s1990_s11 }
0x1873   :  { %p2579_p10 = scmp.ne.s32.totalorder %s1990_s11, %s2578_s14  ;;  %p2584_p12 = scmp.lt.s32.totalorder %s2578_s14, %s2578_s14 }
0x1875   :  { %p2585_p13 = por %p2584_p12, %p2583_p11 }
0x1877   :  { %p2586_p0 = pnand %p2585_p13, %p2579_p10 }
0x1879   :  { %2589 = shalt.err (!%p2586_p0)
}
0x187a   :  { %1992 = dma.vmem_to_hbm [thread:$0]  %s1990_s11, 128, %s3104_s6, [#allocation5]  }
0x187b   :  { %s2638_s2 = smov [#allocation9]  }
0x187c   :  { %s2009_s17 = sshll.u32 %s2638_s2, 4  ;;  %s2010_s17 = int_to_ptr.vmem [resolvable:$true] %s2009_s17 }
0x187d   :  { %s2598_s18 = scalar_lea.vmem %s2010_s17, 128  ;;  %p2603_p2 = scmp.lt.s32.totalorder %s2010_s17, %s2010_s17 }
0x187e   :  { %p2599_p1 = scmp.ne.s32.totalorder %s2010_s17, %s2598_s18  ;;  %p2604_p3 = scmp.lt.s32.totalorder %s2598_s18, %s2598_s18 }
0x1880   :  { %p2605_p4 = por %p2604_p3, %p2603_p2 }
0x1882   :  { %p2606_p5 = pnand %p2605_p4, %p2599_p1 }
0x1884   :  { %2609 = shalt.err (!%p2606_p5)
}
0x1885   :  { %2012 = dma.vmem_to_hbm [thread:$0]  %s2010_s17, 128, %s3106_s8, [#allocation8]   ;;  %v2098_v59 = vld [vmem:[#allocation3 + $0xe0] ss:$0 sm:$0xff]  ;;  %vm1970_vm8 = vcmask 7168  }
0x191b   :  { %v2392_v62 = vpop.f32.mrf.mxu1 }
0x191c   :  { %v1937_v1 = vadd.f32 %v2392_v62, %v2098_v59 }
0x191d   :  { %v1931_v2 = vpop.f32.mrf.mxu1 }
0x191e   :  { %1972 = vst.msk [vmem:[%s3102_s4 + $0x8] sm:$0xff] %vm1970_vm8, %v1937_v1  ;;  %v1932_v4 = vadd.f32 %v2098_v59, %v1931_v2 }
0x191f   :  { %v2395_v33 = vpop.f32.mrf.mxu1 }
0x1920   :  { %1971 = vst.msk [vmem:[%s3102_s4] sm:$0xff] %vm1970_vm8, %v1932_v4  ;;  %v1947_v21 = vadd.f32 %v2395_v33, %v2098_v59 }
0x1921   :  { %v1941_v46 = vpop.f32.mrf.mxu1 }
0x1922   :  { %1974 = vst.msk [vmem:[%s3102_s4 + $0x18] sm:$0xff] %vm1970_vm8, %v1947_v21  ;;  %v1942_v60 = vadd.f32 %v2098_v59, %v1941_v46 }
0x1924   :  { %1973 = vst.msk [vmem:[%s3102_s4 + $0x10] sm:$0xff] %vm1970_vm8, %v1942_v60 }
0x1927   :  { %v2398_v41 = vpop.f32.mrf.mxu1 }
0x1928   :  { %v1957_v5 = vadd.f32 %v2398_v41, %v2098_v59 }
0x1929   :  { %v1951_v63 = vpop.f32.mrf.mxu1 }
0x192a   :  { %1976 = vst.msk [vmem:[%s3102_s4 + $0x28] sm:$0xff] %vm1970_vm8, %v1957_v5  ;;  %v1952_v7 = vadd.f32 %v2098_v59, %v1951_v63 }
0x192c   :  { %1975 = vst.msk [vmem:[%s3102_s4 + $0x20] sm:$0xff] %vm1970_vm8, %v1952_v7 }
0x192f   :  { %v2401_v13 = vpop.f32.mrf.mxu1 }
0x1930   :  { %v1967_v35 = vadd.f32 %v2401_v13, %v2098_v59 }
0x1931   :  { %v1961_v8 = vpop.f32.mrf.mxu1 }
0x1932   :  { %1978 = vst.msk [vmem:[%s3102_s4 + $0x38] sm:$0xff] %vm1970_vm8, %v1967_v35  ;;  %v1962_v55 = vadd.f32 %v2098_v59, %v1961_v8 }
0x1934   :  { %1977 = vst.msk [vmem:[%s3102_s4 + $0x30] sm:$0xff] %vm1970_vm8, %v1962_v55 }
0x1935   :  { %2620 = dma.done.wait [#allocation5], 128  }
0x1936   :  { %2621 = vsyncadd [#allocation5], 4294967168 }
0x1937   :  { %2622 = dma.done.wait [#allocation8], 256  }
0x1938   :  { %2623 = vsyncadd [#allocation8], 4294967040 }
0x1939   :  { %2026 = vsyncpa [#allocation4], 1 }
0x193a   :  { %2027 = vsyncpa [#allocation5], 1 }
0x193b   :  { %2028 = vsyncpa [#allocation8], 1 }

</bundles_post_ra>
